<compile_context>
chip_gen: v7x
topology: tpu7x:2x2x1
jax: 0.10.0
libtpu: 0.0.40
codegen_flags: <defaults>
</compile_context>

<pallas_src>
import math
import functools

import jax
import jax.numpy as jnp
from jax import lax
from jax.experimental import pallas as pl
from jax.experimental.pallas import tpu as pltpu


def _mhsa_kernel(x_ref, wqkv_ref, bqkv_ref, wo_ref, bo_ref, o_ref, *, head: int):
    bt, n, f = x_ref.shape
    hd = f // head

    # Fused QKV projection over every row in the block: one lane-dense
    # (bt*n, f) @ (f, 3f) MXU matmul with f32 accumulation.  The 1/sqrt(feats)
    # softmax scale is pre-folded into the Q columns / Q bias on the host.
    x2d = x_ref[...].reshape(bt * n, f)                              # bf16
    qkv = jnp.dot(x2d, wqkv_ref[...],
                  preferred_element_type=jnp.float32) + bqkv_ref[...]  # f32

    bo = bo_ref[...]                                                 # (1, f) f32

    # Per-(batch, head) attention.  bt and head are static Python ints, so the
    # loops fully unroll; everything stays in registers (no per-head scratch,
    # no masked lane-partial stores, no concatenate).  The output projection
    # is distributed over heads, which is algebraically identical to
    # concatenating heads and doing one (n, f) @ (f, f) matmul.
    for b in range(bt):
        r0, r1 = b * n, (b + 1) * n
        out_b = jnp.zeros((n, f), jnp.float32)
        for h in range(head):
            c0, c1 = h * hd, (h + 1) * hd
            qh = qkv[r0:r1, c0:c1].astype(jnp.bfloat16)              # (n, hd)
            kh = qkv[r0:r1, f + c0:f + c1].astype(jnp.bfloat16)      # (n, hd)
            vh = qkv[r0:r1, 2 * f + c0:2 * f + c1].astype(jnp.bfloat16)

            # Scores: contract head_dim of Q and K directly (no K transpose).
            s = lax.dot_general(qh, kh, (((1,), (1,)), ((), ())),
                                preferred_element_type=jnp.float32)  # (n, n)

            # Numerically-stable softmax, elementwise in f32 (v5e-safe).
            s = s - jnp.max(s, axis=-1, keepdims=True)
            p = jnp.exp(s)
            p = p * pl.reciprocal(jnp.sum(p, axis=-1, keepdims=True),
                                  approx=True)

            ctx = jnp.dot(p.astype(jnp.bfloat16), vh,
                          preferred_element_type=jnp.float32)        # (n, hd) f32

            # Distributed output projection: ctx_h @ Wo[h] accumulated in f32.
            out_b = out_b + jnp.dot(ctx.astype(jnp.bfloat16), wo_ref[h],
                                    preferred_element_type=jnp.float32)

        # Single lane-dense (full-f) store for this batch's row block.
        o_ref[b] = (out_b + bo).astype(o_ref.dtype)


def _pick_batch_tile(b: int, n: int, target_rows: int = 256) -> int:
    """Largest divisor of b with ~<=target rows per step and >=2 grid steps
    (when b >= 2) so both v7x TensorCores get parallel work."""
    best = 1
    for bt in range(1, b + 1):
        if b % bt:
            continue
        if b >= 2 and (b // bt) < 2:
            continue
        if bt * n <= max(target_rows, n):
            best = bt
    return best


def _estimate_vmem_bytes(bt: int, n: int, f: int) -> int:
    act = bt * n * f
    blocks = 2 * act * 2 + 2 * act * 4                         # x (bf16) + out (f32), 2-buffered
    weights = 2 * (f * 3 * f * 2 + 3 * f * 4 + f * f * 2 + f * 4)
    live = bt * n * 3 * f * 4 + 2 * n * n * 4 + n * f * 4      # qkv + score/prob + out_b
    return blocks + weights + 2 * live


def _vmem_limit_bytes(estimate: int) -> int:
    capacity = 128 * 1024 * 1024
    try:
        capacity = int(pltpu.get_tpu_info().vmem_capacity_bytes)
    except Exception:
        pass  # fall back to the v5e/v6e capacity; the cap below stays safe
    # >= the 32 MiB scoped default, <= ~75% of physical VMEM per generation
    # (~48 MiB on v7x, ~96 MiB on v5e/v6e).
    return int(min(max(2 * estimate, 32 * 1024 * 1024), (capacity * 3) // 4))


def multi_head_self_attention(x, params, *, head: int):
    """x: (b, n, f) float32. params: dict of wq,bq,wk,bk,wv,bv,wo,bo (f32)."""
    b, n, f = x.shape
    assert f % head == 0
    hd = f // head
    inv_sqrt_d = 1.0 / (float(f) ** 0.5)

    # Host-side packing (constants in a real model): fuse QKV, fold the
    # softmax scale into Q, pre-split Wo by head, cast weights to bf16.
    wqkv = jnp.concatenate(
        [params["wq"] * inv_sqrt_d, params["wk"], params["wv"]],
        axis=1).astype(jnp.bfloat16)                             # (f, 3f)
    bqkv = jnp.concatenate(
        [params["bq"] * inv_sqrt_d, params["bk"], params["bv"]],
        axis=1).astype(jnp.float32)                              # (1, 3f)
    wo = params["wo"].reshape(head, hd, f).astype(jnp.bfloat16)  # (head, hd, f)
    bo = params["bo"].astype(jnp.float32)                        # (1, f)
    x_bf16 = x.astype(jnp.bfloat16)

    bt = _pick_batch_tile(b, n)
    grid = (b // bt,)

    kernel = functools.partial(_mhsa_kernel, head=head)

    cost = pl.CostEstimate(
        flops=int(b * (8 * n * f * f + 4 * n * n * f)),
        transcendentals=int(b * head * n * n),
        bytes_accessed=int(b * n * f * 2          # x (bf16)
                           + f * 3 * f * 2        # wqkv (bf16)
                           + 3 * f * 4            # bqkv (f32)
                           + f * f * 2            # wo (bf16)
                           + f * 4                # bo (f32)
                           + b * n * f * 4),      # output (f32, module dtype)
    )

    return pl.pallas_call(
        kernel,
        out_shape=jax.ShapeDtypeStruct((b, n, f), jnp.float32),
        grid_spec=pltpu.PrefetchScalarGridSpec(
            num_scalar_prefetch=0,
            grid=grid,
            in_specs=[
                pl.BlockSpec((bt, n, f), lambda i: (i, 0, 0)),       # x
                pl.BlockSpec((f, 3 * f), lambda i: (0, 0)),          # wqkv
                pl.BlockSpec((1, 3 * f), lambda i: (0, 0)),          # bqkv
                pl.BlockSpec((head, hd, f), lambda i: (0, 0, 0)),    # wo (head-major)
                pl.BlockSpec((1, f), lambda i: (0, 0)),              # bo
            ],
            out_specs=pl.BlockSpec((bt, n, f), lambda i: (i, 0, 0)),
        ),
        compiler_params=pltpu.CompilerParams(
            dimension_semantics=("parallel",),
            vmem_limit_bytes=_vmem_limit_bytes(_estimate_vmem_bytes(bt, n, f)),
        ),
        cost_estimate=cost,
    )(x_bf16, wqkv, bqkv, wo, bo)


def _reference(x, params, *, head: int):
    """Pure-JAX f32 reference mirroring the PyTorch forward (dropout = id)."""
    b, n, f = x.shape
    hd = f // head
    sqrt_d = float(f) ** 0.5

    def lin(t, w, bias):
        return jnp.einsum("bnf,fg->bng", t, w) + bias[0]

    q = lin(x, params["wq"], params["bq"]).reshape(b, n, head, hd).transpose(0, 2, 1, 3)
    k = lin(x, params["wk"], params["bk"]).reshape(b, n, head, hd).transpose(0, 2, 1, 3)
    v = lin(x, params["wv"], params["bv"]).reshape(b, n, head, hd).transpose(0, 2, 1, 3)

    score = jax.nn.softmax(jnp.einsum("bhif,bhjf->bhij", q, k) / sqrt_d, axis=-1)
    attn = jnp.einsum("bhij,bhjf->bihf", score, v).reshape(b, n, f)
    return lin(attn, params["wo"], params["bo"])


def init_params(key, feats: int):
    """Deterministic init matching nn.Linear's U(-1/sqrt(f), 1/sqrt(f))."""
    bound = 1.0 / math.sqrt(feats)
    keys = jax.random.split(key, 8)

    def u(k, shape):
        return jax.random.uniform(k, shape, jnp.float32, -bound, bound)

    return {
        "wq": u(keys[0], (feats, feats)), "bq": u(keys[1], (1, feats)),
        "wk": u(keys[2], (feats, feats)), "bk": u(keys[3], (1, feats)),
        "wv": u(keys[4], (feats, feats)), "bv": u(keys[5], (1, feats)),
        "wo": u(keys[6], (feats, feats)), "bo": u(keys[7], (1, feats)),
    }


if __name__ == "__main__":
    B, N, FEATS, HEAD = 2, 8, 32, 8

    key = jax.random.PRNGKey(0)
    k_x, k_p = jax.random.split(key)
    x = jax.random.normal(k_x, (B, N, FEATS), dtype=jnp.float32)
    params = init_params(k_p, FEATS)

    out = multi_head_self_attention(x, params, head=HEAD)
    out = jax.block_until_ready(out)

    ref = _reference(x, params, head=HEAD)
    assert out.shape == (B, N, FEATS)
    max_diff = float(jnp.max(jnp.abs(out - ref)))
    # bf16 MXU inputs + approx reciprocal -> loosened tolerance.
    assert jnp.allclose(out, ref, atol=3e-2, rtol=3e-2), \
        f"mismatch vs reference (max abs diff {max_diff:.3e})"

    print("KERNEL_OK")
</pallas_src>

<mosaic_0001>
module attributes {stable_mosaic.version = 11 : i64} {
  func.func @_mhsa_kernel(%arg0: i32, %arg1: memref<1x8x32xbf16, #tpu.memory_space<vmem>>, %arg2: memref<32x96xbf16, #tpu.memory_space<vmem>>, %arg3: memref<1x96xf32, #tpu.memory_space<vmem>>, %arg4: memref<8x4x32xbf16, #tpu.memory_space<vmem>>, %arg5: memref<1x32xf32, #tpu.memory_space<vmem>>, %arg6: memref<1x8x32xf32, #tpu.memory_space<vmem>>) attributes {dimension_semantics = [#tpu.dimension_semantics<parallel>], iteration_bounds = array<i64: 2>, scalar_prefetch = 0 : i64, scratch_operands = 0 : i64, tpu.core_type = #tpu.core_type<tc>, window_params = [{transform_indices = @transform_0, window_bounds = array<i64: 1, 8, 32>}, {pipeline_mode = #tpu.pipeline_mode<synchronous>, transform_indices = @transform_1, window_bounds = array<i64: 32, 96>}, {pipeline_mode = #tpu.pipeline_mode<synchronous>, transform_indices = @transform_2, window_bounds = array<i64: 1, 96>}, {pipeline_mode = #tpu.pipeline_mode<synchronous>, transform_indices = @transform_3, window_bounds = array<i64: 8, 4, 32>}, {pipeline_mode = #tpu.pipeline_mode<synchronous>, transform_indices = @transform_4, window_bounds = array<i64: 1, 32>}, {transform_indices = @transform_5, window_bounds = array<i64: 1, 8, 32>}]} {
    %c0 = arith.constant 0 : index
    %c0_0 = arith.constant 0 : index
    %c0_1 = arith.constant 0 : index
    %0 = vector.load %arg1[%c0, %c0_0, %c0_1] : memref<1x8x32xbf16, #tpu.memory_space<vmem>>, vector<1x8x32xbf16>
    %1 = vector.shape_cast %0 : vector<1x8x32xbf16> to vector<8x32xbf16>
    %c0_2 = arith.constant 0 : index
    %c0_3 = arith.constant 0 : index
    %2 = vector.load %arg2[%c0_2, %c0_3] : memref<32x96xbf16, #tpu.memory_space<vmem>>, vector<32x96xbf16>
    %cst = arith.constant dense<0.000000e+00> : vector<8x96xf32>
    %3 = tpu.matmul %1, %2, %cst {dimension_numbers = #tpu.dot_dimension_numbers<[1], [0], [0], [1], [0, 0, 1, 1], [], []>} : vector<8x32xbf16>, vector<32x96xbf16>, vector<8x96xf32> -> vector<8x96xf32>
    %c0_4 = arith.constant 0 : index
    %c0_5 = arith.constant 0 : index
    %4 = vector.load %arg3[%c0_4, %c0_5] : memref<1x96xf32, #tpu.memory_space<vmem>>, vector<1x96xf32>
    %5 = vector.broadcast %4 : vector<1x96xf32> to vector<8x96xf32>
    %6 = arith.addf %3, %5 : vector<8x96xf32>
    %c0_6 = arith.constant 0 : index
    %c0_7 = arith.constant 0 : index
    %7 = vector.load %arg5[%c0_6, %c0_7] : memref<1x32xf32, #tpu.memory_space<vmem>>, vector<1x32xf32>
    %cst_8 = arith.constant 0.000000e+00 : f32
    %8 = vector.broadcast %cst_8 : f32 to vector<8x32xf32>
    %9 = vector.extract_strided_slice %6 {offsets = [0, 0], sizes = [8, 4], strides = [1, 1]} : vector<8x96xf32> to vector<8x4xf32>
    %10 = arith.truncf %9 : vector<8x4xf32> to vector<8x4xbf16>
    %11 = vector.extract_strided_slice %6 {offsets = [0, 32], sizes = [8, 4], strides = [1, 1]} : vector<8x96xf32> to vector<8x4xf32>
    %12 = arith.truncf %11 : vector<8x4xf32> to vector<8x4xbf16>
    %13 = vector.extract_strided_slice %6 {offsets = [0, 64], sizes = [8, 4], strides = [1, 1]} : vector<8x96xf32> to vector<8x4xf32>
    %14 = arith.truncf %13 : vector<8x4xf32> to vector<8x4xbf16>
    %cst_9 = arith.constant dense<0.000000e+00> : vector<8x8xf32>
    %15 = tpu.matmul %10, %12, %cst_9 {dimension_numbers = #tpu.dot_dimension_numbers<[1], [1], [0], [0], [0, 0, 1, 0], [], []>} : vector<8x4xbf16>, vector<8x4xbf16>, vector<8x8xf32> -> vector<8x8xf32>
    %cst_10 = arith.constant dense<0xFF800000> : vector<8xf32>
    %16 = vector.multi_reduction <maximumf>, %15, %cst_10 [1] : vector<8x8xf32> to vector<8xf32>
    %17 = vector.shape_cast %16 : vector<8xf32> to vector<8x1xf32>
    %18 = vector.broadcast %17 : vector<8x1xf32> to vector<8x8xf32>
    %19 = arith.subf %15, %18 : vector<8x8xf32>
    %20 = math.exp %19 : vector<8x8xf32>
    %cst_11 = arith.constant dense<0.000000e+00> : vector<8xf32>
    %21 = vector.multi_reduction <add>, %20, %cst_11 [1] : vector<8x8xf32> to vector<8xf32>
    %22 = vector.shape_cast %21 : vector<8xf32> to vector<8x1xf32>
    %23 = tpu.reciprocal %22 {approx = true} : vector<8x1xf32> -> vector<8x1xf32>
    %24 = vector.broadcast %23 : vector<8x1xf32> to vector<8x8xf32>
    %25 = arith.mulf %20, %24 : vector<8x8xf32>
    %26 = arith.truncf %25 : vector<8x8xf32> to vector<8x8xbf16>
    %cst_12 = arith.constant dense<0.000000e+00> : vector<8x4xf32>
    %27 = tpu.matmul %26, %14, %cst_12 {dimension_numbers = #tpu.dot_dimension_numbers<[1], [0], [0], [1], [0, 0, 1, 1], [], []>} : vector<8x8xbf16>, vector<8x4xbf16>, vector<8x4xf32> -> vector<8x4xf32>
    %28 = arith.truncf %27 : vector<8x4xf32> to vector<8x4xbf16>
    %c0_13 = arith.constant 0 : index
    %c0_14 = arith.constant 0 : index
    %c0_15 = arith.constant 0 : index
    %29 = vector.load %arg4[%c0_13, %c0_14, %c0_15] : memref<8x4x32xbf16, #tpu.memory_space<vmem>>, vector<1x4x32xbf16>
    %30 = vector.shape_cast %29 : vector<1x4x32xbf16> to vector<4x32xbf16>
    %cst_16 = arith.constant dense<0.000000e+00> : vector<8x32xf32>
    %31 = tpu.matmul %28, %30, %cst_16 {dimension_numbers = #tpu.dot_dimension_numbers<[1], [0], [0], [1], [0, 0, 1, 1], [], []>} : vector<8x4xbf16>, vector<4x32xbf16>, vector<8x32xf32> -> vector<8x32xf32>
    %32 = arith.addf %8, %31 : vector<8x32xf32>
    %33 = vector.extract_strided_slice %6 {offsets = [0, 4], sizes = [8, 4], strides = [1, 1]} : vector<8x96xf32> to vector<8x4xf32>
    %34 = arith.truncf %33 : vector<8x4xf32> to vector<8x4xbf16>
    %35 = vector.extract_strided_slice %6 {offsets = [0, 36], sizes = [8, 4], strides = [1, 1]} : vector<8x96xf32> to vector<8x4xf32>
    %36 = arith.truncf %35 : vector<8x4xf32> to vector<8x4xbf16>
    %37 = vector.extract_strided_slice %6 {offsets = [0, 68], sizes = [8, 4], strides = [1, 1]} : vector<8x96xf32> to vector<8x4xf32>
    %38 = arith.truncf %37 : vector<8x4xf32> to vector<8x4xbf16>
    %cst_17 = arith.constant dense<0.000000e+00> : vector<8x8xf32>
    %39 = tpu.matmul %34, %36, %cst_17 {dimension_numbers = #tpu.dot_dimension_numbers<[1], [1], [0], [0], [0, 0, 1, 0], [], []>} : vector<8x4xbf16>, vector<8x4xbf16>, vector<8x8xf32> -> vector<8x8xf32>
    %cst_18 = arith.constant dense<0xFF800000> : vector<8xf32>
    %40 = vector.multi_reduction <maximumf>, %39, %cst_18 [1] : vector<8x8xf32> to vector<8xf32>
    %41 = vector.shape_cast %40 : vector<8xf32> to vector<8x1xf32>
    %42 = vector.broadcast %41 : vector<8x1xf32> to vector<8x8xf32>
    %43 = arith.subf %39, %42 : vector<8x8xf32>
    %44 = math.exp %43 : vector<8x8xf32>
    %cst_19 = arith.constant dense<0.000000e+00> : vector<8xf32>
    %45 = vector.multi_reduction <add>, %44, %cst_19 [1] : vector<8x8xf32> to vector<8xf32>
    %46 = vector.shape_cast %45 : vector<8xf32> to vector<8x1xf32>
    %47 = tpu.reciprocal %46 {approx = true} : vector<8x1xf32> -> vector<8x1xf32>
    %48 = vector.broadcast %47 : vector<8x1xf32> to vector<8x8xf32>
    %49 = arith.mulf %44, %48 : vector<8x8xf32>
    %50 = arith.truncf %49 : vector<8x8xf32> to vector<8x8xbf16>
    %cst_20 = arith.constant dense<0.000000e+00> : vector<8x4xf32>
    %51 = tpu.matmul %50, %38, %cst_20 {dimension_numbers = #tpu.dot_dimension_numbers<[1], [0], [0], [1], [0, 0, 1, 1], [], []>} : vector<8x8xbf16>, vector<8x4xbf16>, vector<8x4xf32> -> vector<8x4xf32>
    %52 = arith.truncf %51 : vector<8x4xf32> to vector<8x4xbf16>
    %c1 = arith.constant 1 : index
    %c0_21 = arith.constant 0 : index
    %c0_22 = arith.constant 0 : index
    %53 = vector.load %arg4[%c1, %c0_21, %c0_22] : memref<8x4x32xbf16, #tpu.memory_space<vmem>>, vector<1x4x32xbf16>
    %54 = vector.shape_cast %53 : vector<1x4x32xbf16> to vector<4x32xbf16>
    %cst_23 = arith.constant dense<0.000000e+00> : vector<8x32xf32>
    %55 = tpu.matmul %52, %54, %cst_23 {dimension_numbers = #tpu.dot_dimension_numbers<[1], [0], [0], [1], [0, 0, 1, 1], [], []>} : vector<8x4xbf16>, vector<4x32xbf16>, vector<8x32xf32> -> vector<8x32xf32>
    %56 = arith.addf %32, %55 : vector<8x32xf32>
    %57 = vector.extract_strided_slice %6 {offsets = [0, 8], sizes = [8, 4], strides = [1, 1]} : vector<8x96xf32> to vector<8x4xf32>
    %58 = arith.truncf %57 : vector<8x4xf32> to vector<8x4xbf16>
    %59 = vector.extract_strided_slice %6 {offsets = [0, 40], sizes = [8, 4], strides = [1, 1]} : vector<8x96xf32> to vector<8x4xf32>
    %60 = arith.truncf %59 : vector<8x4xf32> to vector<8x4xbf16>
    %61 = vector.extract_strided_slice %6 {offsets = [0, 72], sizes = [8, 4], strides = [1, 1]} : vector<8x96xf32> to vector<8x4xf32>
    %62 = arith.truncf %61 : vector<8x4xf32> to vector<8x4xbf16>
    %cst_24 = arith.constant dense<0.000000e+00> : vector<8x8xf32>
    %63 = tpu.matmul %58, %60, %cst_24 {dimension_numbers = #tpu.dot_dimension_numbers<[1], [1], [0], [0], [0, 0, 1, 0], [], []>} : vector<8x4xbf16>, vector<8x4xbf16>, vector<8x8xf32> -> vector<8x8xf32>
    %cst_25 = arith.constant dense<0xFF800000> : vector<8xf32>
    %64 = vector.multi_reduction <maximumf>, %63, %cst_25 [1] : vector<8x8xf32> to vector<8xf32>
    %65 = vector.shape_cast %64 : vector<8xf32> to vector<8x1xf32>
    %66 = vector.broadcast %65 : vector<8x1xf32> to vector<8x8xf32>
    %67 = arith.subf %63, %66 : vector<8x8xf32>
    %68 = math.exp %67 : vector<8x8xf32>
    %cst_26 = arith.constant dense<0.000000e+00> : vector<8xf32>
    %69 = vector.multi_reduction <add>, %68, %cst_26 [1] : vector<8x8xf32> to vector<8xf32>
    %70 = vector.shape_cast %69 : vector<8xf32> to vector<8x1xf32>
    %71 = tpu.reciprocal %70 {approx = true} : vector<8x1xf32> -> vector<8x1xf32>
    %72 = vector.broadcast %71 : vector<8x1xf32> to vector<8x8xf32>
    %73 = arith.mulf %68, %72 : vector<8x8xf32>
    %74 = arith.truncf %73 : vector<8x8xf32> to vector<8x8xbf16>
    %cst_27 = arith.constant dense<0.000000e+00> : vector<8x4xf32>
    %75 = tpu.matmul %74, %62, %cst_27 {dimension_numbers = #tpu.dot_dimension_numbers<[1], [0], [0], [1], [0, 0, 1, 1], [], []>} : vector<8x8xbf16>, vector<8x4xbf16>, vector<8x4xf32> -> vector<8x4xf32>
    %76 = arith.truncf %75 : vector<8x4xf32> to vector<8x4xbf16>
    %c2 = arith.constant 2 : index
    %c0_28 = arith.constant 0 : index
    %c0_29 = arith.constant 0 : index
    %77 = vector.load %arg4[%c2, %c0_28, %c0_29] : memref<8x4x32xbf16, #tpu.memory_space<vmem>>, vector<1x4x32xbf16>
    %78 = vector.shape_cast %77 : vector<1x4x32xbf16> to vector<4x32xbf16>
    %cst_30 = arith.constant dense<0.000000e+00> : vector<8x32xf32>
    %79 = tpu.matmul %76, %78, %cst_30 {dimension_numbers = #tpu.dot_dimension_numbers<[1], [0], [0], [1], [0, 0, 1, 1], [], []>} : vector<8x4xbf16>, vector<4x32xbf16>, vector<8x32xf32> -> vector<8x32xf32>
    %80 = arith.addf %56, %79 : vector<8x32xf32>
    %81 = vector.extract_strided_slice %6 {offsets = [0, 12], sizes = [8, 4], strides = [1, 1]} : vector<8x96xf32> to vector<8x4xf32>
    %82 = arith.truncf %81 : vector<8x4xf32> to vector<8x4xbf16>
    %83 = vector.extract_strided_slice %6 {offsets = [0, 44], sizes = [8, 4], strides = [1, 1]} : vector<8x96xf32> to vector<8x4xf32>
    %84 = arith.truncf %83 : vector<8x4xf32> to vector<8x4xbf16>
    %85 = vector.extract_strided_slice %6 {offsets = [0, 76], sizes = [8, 4], strides = [1, 1]} : vector<8x96xf32> to vector<8x4xf32>
    %86 = arith.truncf %85 : vector<8x4xf32> to vector<8x4xbf16>
    %cst_31 = arith.constant dense<0.000000e+00> : vector<8x8xf32>
    %87 = tpu.matmul %82, %84, %cst_31 {dimension_numbers = #tpu.dot_dimension_numbers<[1], [1], [0], [0], [0, 0, 1, 0], [], []>} : vector<8x4xbf16>, vector<8x4xbf16>, vector<8x8xf32> -> vector<8x8xf32>
    %cst_32 = arith.constant dense<0xFF800000> : vector<8xf32>
    %88 = vector.multi_reduction <maximumf>, %87, %cst_32 [1] : vector<8x8xf32> to vector<8xf32>
    %89 = vector.shape_cast %88 : vector<8xf32> to vector<8x1xf32>
    %90 = vector.broadcast %89 : vector<8x1xf32> to vector<8x8xf32>
    %91 = arith.subf %87, %90 : vector<8x8xf32>
    %92 = math.exp %91 : vector<8x8xf32>
    %cst_33 = arith.constant dense<0.000000e+00> : vector<8xf32>
    %93 = vector.multi_reduction <add>, %92, %cst_33 [1] : vector<8x8xf32> to vector<8xf32>
    %94 = vector.shape_cast %93 : vector<8xf32> to vector<8x1xf32>
    %95 = tpu.reciprocal %94 {approx = true} : vector<8x1xf32> -> vector<8x1xf32>
    %96 = vector.broadcast %95 : vector<8x1xf32> to vector<8x8xf32>
    %97 = arith.mulf %92, %96 : vector<8x8xf32>
    %98 = arith.truncf %97 : vector<8x8xf32> to vector<8x8xbf16>
    %cst_34 = arith.constant dense<0.000000e+00> : vector<8x4xf32>
    %99 = tpu.matmul %98, %86, %cst_34 {dimension_numbers = #tpu.dot_dimension_numbers<[1], [0], [0], [1], [0, 0, 1, 1], [], []>} : vector<8x8xbf16>, vector<8x4xbf16>, vector<8x4xf32> -> vector<8x4xf32>
    %100 = arith.truncf %99 : vector<8x4xf32> to vector<8x4xbf16>
    %c3 = arith.constant 3 : index
    %c0_35 = arith.constant 0 : index
    %c0_36 = arith.constant 0 : index
    %101 = vector.load %arg4[%c3, %c0_35, %c0_36] : memref<8x4x32xbf16, #tpu.memory_space<vmem>>, vector<1x4x32xbf16>
    %102 = vector.shape_cast %101 : vector<1x4x32xbf16> to vector<4x32xbf16>
    %cst_37 = arith.constant dense<0.000000e+00> : vector<8x32xf32>
    %103 = tpu.matmul %100, %102, %cst_37 {dimension_numbers = #tpu.dot_dimension_numbers<[1], [0], [0], [1], [0, 0, 1, 1], [], []>} : vector<8x4xbf16>, vector<4x32xbf16>, vector<8x32xf32> -> vector<8x32xf32>
    %104 = arith.addf %80, %103 : vector<8x32xf32>
    %105 = vector.extract_strided_slice %6 {offsets = [0, 16], sizes = [8, 4], strides = [1, 1]} : vector<8x96xf32> to vector<8x4xf32>
    %106 = arith.truncf %105 : vector<8x4xf32> to vector<8x4xbf16>
    %107 = vector.extract_strided_slice %6 {offsets = [0, 48], sizes = [8, 4], strides = [1, 1]} : vector<8x96xf32> to vector<8x4xf32>
    %108 = arith.truncf %107 : vector<8x4xf32> to vector<8x4xbf16>
    %109 = vector.extract_strided_slice %6 {offsets = [0, 80], sizes = [8, 4], strides = [1, 1]} : vector<8x96xf32> to vector<8x4xf32>
    %110 = arith.truncf %109 : vector<8x4xf32> to vector<8x4xbf16>
    %cst_38 = arith.constant dense<0.000000e+00> : vector<8x8xf32>
    %111 = tpu.matmul %106, %108, %cst_38 {dimension_numbers = #tpu.dot_dimension_numbers<[1], [1], [0], [0], [0, 0, 1, 0], [], []>} : vector<8x4xbf16>, vector<8x4xbf16>, vector<8x8xf32> -> vector<8x8xf32>
    %cst_39 = arith.constant dense<0xFF800000> : vector<8xf32>
    %112 = vector.multi_reduction <maximumf>, %111, %cst_39 [1] : vector<8x8xf32> to vector<8xf32>
    %113 = vector.shape_cast %112 : vector<8xf32> to vector<8x1xf32>
    %114 = vector.broadcast %113 : vector<8x1xf32> to vector<8x8xf32>
    %115 = arith.subf %111, %114 : vector<8x8xf32>
    %116 = math.exp %115 : vector<8x8xf32>
    %cst_40 = arith.constant dense<0.000000e+00> : vector<8xf32>
    %117 = vector.multi_reduction <add>, %116, %cst_40 [1] : vector<8x8xf32> to vector<8xf32>
    %118 = vector.shape_cast %117 : vector<8xf32> to vector<8x1xf32>
    %119 = tpu.reciprocal %118 {approx = true} : vector<8x1xf32> -> vector<8x1xf32>
    %120 = vector.broadcast %119 : vector<8x1xf32> to vector<8x8xf32>
    %121 = arith.mulf %116, %120 : vector<8x8xf32>
    %122 = arith.truncf %121 : vector<8x8xf32> to vector<8x8xbf16>
    %cst_41 = arith.constant dense<0.000000e+00> : vector<8x4xf32>
    %123 = tpu.matmul %122, %110, %cst_41 {dimension_numbers = #tpu.dot_dimension_numbers<[1], [0], [0], [1], [0, 0, 1, 1], [], []>} : vector<8x8xbf16>, vector<8x4xbf16>, vector<8x4xf32> -> vector<8x4xf32>
    %124 = arith.truncf %123 : vector<8x4xf32> to vector<8x4xbf16>
    %c4 = arith.constant 4 : index
    %c0_42 = arith.constant 0 : index
    %c0_43 = arith.constant 0 : index
    %125 = vector.load %arg4[%c4, %c0_42, %c0_43] : memref<8x4x32xbf16, #tpu.memory_space<vmem>>, vector<1x4x32xbf16>
    %126 = vector.shape_cast %125 : vector<1x4x32xbf16> to vector<4x32xbf16>
    %cst_44 = arith.constant dense<0.000000e+00> : vector<8x32xf32>
    %127 = tpu.matmul %124, %126, %cst_44 {dimension_numbers = #tpu.dot_dimension_numbers<[1], [0], [0], [1], [0, 0, 1, 1], [], []>} : vector<8x4xbf16>, vector<4x32xbf16>, vector<8x32xf32> -> vector<8x32xf32>
    %128 = arith.addf %104, %127 : vector<8x32xf32>
    %129 = vector.extract_strided_slice %6 {offsets = [0, 20], sizes = [8, 4], strides = [1, 1]} : vector<8x96xf32> to vector<8x4xf32>
    %130 = arith.truncf %129 : vector<8x4xf32> to vector<8x4xbf16>
    %131 = vector.extract_strided_slice %6 {offsets = [0, 52], sizes = [8, 4], strides = [1, 1]} : vector<8x96xf32> to vector<8x4xf32>
    %132 = arith.truncf %131 : vector<8x4xf32> to vector<8x4xbf16>
    %133 = vector.extract_strided_slice %6 {offsets = [0, 84], sizes = [8, 4], strides = [1, 1]} : vector<8x96xf32> to vector<8x4xf32>
    %134 = arith.truncf %133 : vector<8x4xf32> to vector<8x4xbf16>
    %cst_45 = arith.constant dense<0.000000e+00> : vector<8x8xf32>
    %135 = tpu.matmul %130, %132, %cst_45 {dimension_numbers = #tpu.dot_dimension_numbers<[1], [1], [0], [0], [0, 0, 1, 0], [], []>} : vector<8x4xbf16>, vector<8x4xbf16>, vector<8x8xf32> -> vector<8x8xf32>
    %cst_46 = arith.constant dense<0xFF800000> : vector<8xf32>
    %136 = vector.multi_reduction <maximumf>, %135, %cst_46 [1] : vector<8x8xf32> to vector<8xf32>
    %137 = vector.shape_cast %136 : vector<8xf32> to vector<8x1xf32>
    %138 = vector.broadcast %137 : vector<8x1xf32> to vector<8x8xf32>
    %139 = arith.subf %135, %138 : vector<8x8xf32>
    %140 = math.exp %139 : vector<8x8xf32>
    %cst_47 = arith.constant dense<0.000000e+00> : vector<8xf32>
    %141 = vector.multi_reduction <add>, %140, %cst_47 [1] : vector<8x8xf32> to vector<8xf32>
    %142 = vector.shape_cast %141 : vector<8xf32> to vector<8x1xf32>
    %143 = tpu.reciprocal %142 {approx = true} : vector<8x1xf32> -> vector<8x1xf32>
    %144 = vector.broadcast %143 : vector<8x1xf32> to vector<8x8xf32>
    %145 = arith.mulf %140, %144 : vector<8x8xf32>
    %146 = arith.truncf %145 : vector<8x8xf32> to vector<8x8xbf16>
    %cst_48 = arith.constant dense<0.000000e+00> : vector<8x4xf32>
    %147 = tpu.matmul %146, %134, %cst_48 {dimension_numbers = #tpu.dot_dimension_numbers<[1], [0], [0], [1], [0, 0, 1, 1], [], []>} : vector<8x8xbf16>, vector<8x4xbf16>, vector<8x4xf32> -> vector<8x4xf32>
    %148 = arith.truncf %147 : vector<8x4xf32> to vector<8x4xbf16>
    %c5 = arith.constant 5 : index
    %c0_49 = arith.constant 0 : index
    %c0_50 = arith.constant 0 : index
    %149 = vector.load %arg4[%c5, %c0_49, %c0_50] : memref<8x4x32xbf16, #tpu.memory_space<vmem>>, vector<1x4x32xbf16>
    %150 = vector.shape_cast %149 : vector<1x4x32xbf16> to vector<4x32xbf16>
    %cst_51 = arith.constant dense<0.000000e+00> : vector<8x32xf32>
    %151 = tpu.matmul %148, %150, %cst_51 {dimension_numbers = #tpu.dot_dimension_numbers<[1], [0], [0], [1], [0, 0, 1, 1], [], []>} : vector<8x4xbf16>, vector<4x32xbf16>, vector<8x32xf32> -> vector<8x32xf32>
    %152 = arith.addf %128, %151 : vector<8x32xf32>
    %153 = vector.extract_strided_slice %6 {offsets = [0, 24], sizes = [8, 4], strides = [1, 1]} : vector<8x96xf32> to vector<8x4xf32>
    %154 = arith.truncf %153 : vector<8x4xf32> to vector<8x4xbf16>
    %155 = vector.extract_strided_slice %6 {offsets = [0, 56], sizes = [8, 4], strides = [1, 1]} : vector<8x96xf32> to vector<8x4xf32>
    %156 = arith.truncf %155 : vector<8x4xf32> to vector<8x4xbf16>
    %157 = vector.extract_strided_slice %6 {offsets = [0, 88], sizes = [8, 4], strides = [1, 1]} : vector<8x96xf32> to vector<8x4xf32>
    %158 = arith.truncf %157 : vector<8x4xf32> to vector<8x4xbf16>
    %cst_52 = arith.constant dense<0.000000e+00> : vector<8x8xf32>
    %159 = tpu.matmul %154, %156, %cst_52 {dimension_numbers = #tpu.dot_dimension_numbers<[1], [1], [0], [0], [0, 0, 1, 0], [], []>} : vector<8x4xbf16>, vector<8x4xbf16>, vector<8x8xf32> -> vector<8x8xf32>
    %cst_53 = arith.constant dense<0xFF800000> : vector<8xf32>
    %160 = vector.multi_reduction <maximumf>, %159, %cst_53 [1] : vector<8x8xf32> to vector<8xf32>
    %161 = vector.shape_cast %160 : vector<8xf32> to vector<8x1xf32>
    %162 = vector.broadcast %161 : vector<8x1xf32> to vector<8x8xf32>
    %163 = arith.subf %159, %162 : vector<8x8xf32>
    %164 = math.exp %163 : vector<8x8xf32>
    %cst_54 = arith.constant dense<0.000000e+00> : vector<8xf32>
    %165 = vector.multi_reduction <add>, %164, %cst_54 [1] : vector<8x8xf32> to vector<8xf32>
    %166 = vector.shape_cast %165 : vector<8xf32> to vector<8x1xf32>
    %167 = tpu.reciprocal %166 {approx = true} : vector<8x1xf32> -> vector<8x1xf32>
    %168 = vector.broadcast %167 : vector<8x1xf32> to vector<8x8xf32>
    %169 = arith.mulf %164, %168 : vector<8x8xf32>
    %170 = arith.truncf %169 : vector<8x8xf32> to vector<8x8xbf16>
    %cst_55 = arith.constant dense<0.000000e+00> : vector<8x4xf32>
    %171 = tpu.matmul %170, %158, %cst_55 {dimension_numbers = #tpu.dot_dimension_numbers<[1], [0], [0], [1], [0, 0, 1, 1], [], []>} : vector<8x8xbf16>, vector<8x4xbf16>, vector<8x4xf32> -> vector<8x4xf32>
    %172 = arith.truncf %171 : vector<8x4xf32> to vector<8x4xbf16>
    %c6 = arith.constant 6 : index
    %c0_56 = arith.constant 0 : index
    %c0_57 = arith.constant 0 : index
    %173 = vector.load %arg4[%c6, %c0_56, %c0_57] : memref<8x4x32xbf16, #tpu.memory_space<vmem>>, vector<1x4x32xbf16>
    %174 = vector.shape_cast %173 : vector<1x4x32xbf16> to vector<4x32xbf16>
    %cst_58 = arith.constant dense<0.000000e+00> : vector<8x32xf32>
    %175 = tpu.matmul %172, %174, %cst_58 {dimension_numbers = #tpu.dot_dimension_numbers<[1], [0], [0], [1], [0, 0, 1, 1], [], []>} : vector<8x4xbf16>, vector<4x32xbf16>, vector<8x32xf32> -> vector<8x32xf32>
    %176 = arith.addf %152, %175 : vector<8x32xf32>
    %177 = vector.extract_strided_slice %6 {offsets = [0, 28], sizes = [8, 4], strides = [1, 1]} : vector<8x96xf32> to vector<8x4xf32>
    %178 = arith.truncf %177 : vector<8x4xf32> to vector<8x4xbf16>
    %179 = vector.extract_strided_slice %6 {offsets = [0, 60], sizes = [8, 4], strides = [1, 1]} : vector<8x96xf32> to vector<8x4xf32>
    %180 = arith.truncf %179 : vector<8x4xf32> to vector<8x4xbf16>
    %181 = vector.extract_strided_slice %6 {offsets = [0, 92], sizes = [8, 4], strides = [1, 1]} : vector<8x96xf32> to vector<8x4xf32>
    %182 = arith.truncf %181 : vector<8x4xf32> to vector<8x4xbf16>
    %cst_59 = arith.constant dense<0.000000e+00> : vector<8x8xf32>
    %183 = tpu.matmul %178, %180, %cst_59 {dimension_numbers = #tpu.dot_dimension_numbers<[1], [1], [0], [0], [0, 0, 1, 0], [], []>} : vector<8x4xbf16>, vector<8x4xbf16>, vector<8x8xf32> -> vector<8x8xf32>
    %cst_60 = arith.constant dense<0xFF800000> : vector<8xf32>
    %184 = vector.multi_reduction <maximumf>, %183, %cst_60 [1] : vector<8x8xf32> to vector<8xf32>
    %185 = vector.shape_cast %184 : vector<8xf32> to vector<8x1xf32>
    %186 = vector.broadcast %185 : vector<8x1xf32> to vector<8x8xf32>
    %187 = arith.subf %183, %186 : vector<8x8xf32>
    %188 = math.exp %187 : vector<8x8xf32>
    %cst_61 = arith.constant dense<0.000000e+00> : vector<8xf32>
    %189 = vector.multi_reduction <add>, %188, %cst_61 [1] : vector<8x8xf32> to vector<8xf32>
    %190 = vector.shape_cast %189 : vector<8xf32> to vector<8x1xf32>
    %191 = tpu.reciprocal %190 {approx = true} : vector<8x1xf32> -> vector<8x1xf32>
    %192 = vector.broadcast %191 : vector<8x1xf32> to vector<8x8xf32>
    %193 = arith.mulf %188, %192 : vector<8x8xf32>
    %194 = arith.truncf %193 : vector<8x8xf32> to vector<8x8xbf16>
    %cst_62 = arith.constant dense<0.000000e+00> : vector<8x4xf32>
    %195 = tpu.matmul %194, %182, %cst_62 {dimension_numbers = #tpu.dot_dimension_numbers<[1], [0], [0], [1], [0, 0, 1, 1], [], []>} : vector<8x8xbf16>, vector<8x4xbf16>, vector<8x4xf32> -> vector<8x4xf32>
    %196 = arith.truncf %195 : vector<8x4xf32> to vector<8x4xbf16>
    %c7 = arith.constant 7 : index
    %c0_63 = arith.constant 0 : index
    %c0_64 = arith.constant 0 : index
    %197 = vector.load %arg4[%c7, %c0_63, %c0_64] : memref<8x4x32xbf16, #tpu.memory_space<vmem>>, vector<1x4x32xbf16>
    %198 = vector.shape_cast %197 : vector<1x4x32xbf16> to vector<4x32xbf16>
    %cst_65 = arith.constant dense<0.000000e+00> : vector<8x32xf32>
    %199 = tpu.matmul %196, %198, %cst_65 {dimension_numbers = #tpu.dot_dimension_numbers<[1], [0], [0], [1], [0, 0, 1, 1], [], []>} : vector<8x4xbf16>, vector<4x32xbf16>, vector<8x32xf32> -> vector<8x32xf32>
    %200 = arith.addf %176, %199 : vector<8x32xf32>
    %201 = vector.broadcast %7 : vector<1x32xf32> to vector<8x32xf32>
    %202 = arith.addf %200, %201 : vector<8x32xf32>
    %c0_66 = arith.constant 0 : index
    %c0_67 = arith.constant 0 : index
    %c0_68 = arith.constant 0 : index
    %203 = vector.load %arg6[%c0_66, %c0_67, %c0_68] : memref<1x8x32xf32, #tpu.memory_space<vmem>>, vector<1x8x32xf32>
    %204 = vector.shape_cast %203 : vector<1x8x32xf32> to vector<8x32xf32>
    %205 = vector.shape_cast %202 : vector<8x32xf32> to vector<1x8x32xf32>
    tpu.vector_store %arg6[%c0_66, %c0_67, %c0_68], %205 {strides = array<i32>} : memref<1x8x32xf32, #tpu.memory_space<vmem>>, vector<1x8x32xf32>,
    return
  }
  func.func @transform_0(%arg0: i32) -> (i32, i32, i32) {
    %c0_i32 = arith.constant 0 : i32
    %c0_i32_0 = arith.constant 0 : i32
    %c0_i32_1 = arith.constant 0 : i32
    return %arg0, %c0_i32, %c0_i32_0 : i32, i32, i32
  }
  func.func @transform_1(%arg0: i32) -> (i32, i32) {
    %c0_i32 = arith.constant 0 : i32
    %c0_i32_0 = arith.constant 0 : i32
    %c0_i32_1 = arith.constant 0 : i32
    return %c0_i32, %c0_i32_0 : i32, i32
  }
  func.func @transform_2(%arg0: i32) -> (i32, i32) {
    %c0_i32 = arith.constant 0 : i32
    %c0_i32_0 = arith.constant 0 : i32
    %c0_i32_1 = arith.constant 0 : i32
    return %c0_i32, %c0_i32_0 : i32, i32
  }
  func.func @transform_3(%arg0: i32) -> (i32, i32, i32) {
    %c0_i32 = arith.constant 0 : i32
    %c0_i32_0 = arith.constant 0 : i32
    %c0_i32_1 = arith.constant 0 : i32
    %c0_i32_2 = arith.constant 0 : i32
    return %c0_i32, %c0_i32_0, %c0_i32_1 : i32, i32, i32
  }
  func.func @transform_4(%arg0: i32) -> (i32, i32) {
    %c0_i32 = arith.constant 0 : i32
    %c0_i32_0 = arith.constant 0 : i32
    %c0_i32_1 = arith.constant 0 : i32
    return %c0_i32, %c0_i32_0 : i32, i32
  }
  func.func @transform_5(%arg0: i32) -> (i32, i32, i32) {
    %c0_i32 = arith.constant 0 : i32
    %c0_i32_0 = arith.constant 0 : i32
    %c0_i32_1 = arith.constant 0 : i32
    return %arg0, %c0_i32, %c0_i32_0 : i32, i32, i32
  }
}

</mosaic_0001>

<bundles_post_ra>
// kernel: tpu_custom_call.1
= control target key start
LH: loop header
LB: loop body
LE: loop exit
PB: predicated region body
PF: predicated region fallthrough
CT: control target
= control target key end

     0   :  { %10 = vsyncpa [#allocation3], 0  ;;  %s2737_s0 = inlined_call_operand.hbm [shape: bf16[2,8,32], index: 0, kind: input, shape index: {}]   ;;  %s2738_s1 = inlined_call_operand.hbm [shape: bf16[32,96], index: 1, kind: input, shape index: {}]   ;;  %s2739_s2 = inlined_call_operand.vmem [shape: f32[1,96], index: 2, kind: input, shape index: {}]   ;;  %s2740_s3 = inlined_call_operand.hbm [shape: bf16[8,4,32], index: 3, kind: input, shape index: {}]   ;;  %s2741_s4 = inlined_call_operand.vmem [shape: f32[1,32], index: 4, kind: input, shape index: {}]   ;;  %s2742_s5 = inlined_call_operand.hbm [shape: f32[2,8,32], index: 5, kind: output, shape index: {}]  }
   0x1   :  { %12 = vsyncpa [#allocation3 + $0x1], 0 }
   0x2   :  { %13 = vsyncpa [#allocation6], 0 }
   0x3   :  { %14 = vsyncpa [#allocation4], 0 }
   0x4   :  { %16 = vsyncpa [#allocation4 + $0x1], 0  ;;  %s2330_s18 = smov 0   ;;  %s2332_s19 = smov 0  }
   0x5   :  { %s2334_s20 = smov 0   ;;  %s2336_s21 = smov 0  }
   0x6 LB: > { %s2351_s22 = sadd.s32 4294967295, %s2265_s21   ;;  %s1731_s23 = sadd.s32 4294967294, %s2265_s21   ;;  %s2265_s21 = sphi %s2336_s21, %s2762_s21   ;;  %s2261_s20 = sphi %s2334_s20, %s2761_s20   ;;  %s2257_s19 = sphi %s2332_s19, %s2760_s19   ;;  %s2253_s18 = sphi %s2330_s18, %s2759_s18  }
   0x7   : > { %p42_p0 = scmp.ne.s32.totalorder %s2257_s19, %s2253_s18  ;;  %p2743_p1 = scmp.eq.s32.totalorder %s2351_s22, 0 }
   0x8   : > { %p156_p3 = scmp.eq.s32.totalorder %s1731_s23, 1  ;;  %p1732_p5 = scmp.ge.s32.totalorder %s2265_s21, 1 }
   0x9   : > { %p2360_p4 = por %p2743_p1, %p42_p0  ;;  %p163_p7 = scmp.lt.s32.totalorder %s2265_s21, 3 }
   0xa   : > { %p2365_p6 = por %p156_p3, %p42_p0  ;;  %s2267_s27 = smov [#allocation5]  }
   0xb   : > { %s2746_s24 = scalar_select %p2360_p4, 1, 0 }
   0xc   : > { %s2747_s25 = scalar_select %p2365_p6, 1, 0 }
   0xd   : > { %p2370_p8 = pnand %p1732_p5, %p163_p7  ;;  %s175_s28 = sshll.u32 %s2267_s27, 4  ;;  %s2374_s28 = int_to_ptr.vmem [resolvable:$true] %s175_s28 }
   0xe   : > { %s2268_s30 = smov [#allocation7]   ;;  %s2109_s9 = scalar_lea.hbm %s2738_s1, 256 }
   0xf   : > { %p1991_p9 = pneg %p2370_p8  ;;  %s191_s6 = sshll.u32 %s2268_s30, 4  ;;  %s2385_s6 = int_to_ptr.vmem [resolvable:$true] %s191_s6 }
  0x10   : > { %p2110_p12 = scmp.ne.s32.totalorder %s2738_s1, %s2109_s9  ;;  %p2116_p5 = scmp.lt.u32.totalorder %s2109_s9, %s2738_s1 }
  0x11   : > { %p2381_p11 = pnand %p1991_p9, %p2743_p1 }
  0x13   : > { %p2111_p13 = pneg %p2381_p11 }
  0x15   : > { %p2112_p0 = pnand %p2111_p13, %p2110_p12 }
  0x17   : > { %p2113_p3 = pneg %p2112_p0 }
  0x19   : > { %p2118_p7 = pnand %p2116_p5, %p2113_p3 }
  0x1b   : > { %2121 = shalt.err (!%p2118_p7)
}
  0x1c   : > { %s2122_s14 = scalar_lea.vmem %s2374_s28, 256  ;;  %p2130_p2 = scmp.lt.s32.totalorder %s2374_s28, %s2374_s28 }
  0x1d   : > { %p2123_p9 = scmp.ne.s32.totalorder %s2374_s28, %s2122_s14  ;;  %p2131_p12 = scmp.lt.s32.totalorder %s2122_s14, %s2122_s14 }
  0x1f   : > { %p2125_p10 = pnand %p2123_p9, %p2111_p13  ;;  %p2132_p0 = por %p2131_p12, %p2130_p2 }
  0x21   : > { %p2126_p1 = pneg %p2125_p10 }
  0x23   : > { %p2133_p6 = pnand %p2132_p0, %p2126_p1 }
  0x25   : > { %2136 = shalt.err (!%p2133_p6)
}
  0x26   : > { %s2269_s15 = smov 64   ;;  %s2270_s16 = smov 4  }
  0x27   : > { %1994 = dma.hbm_to_vmem [thread:$0]  (!%p2381_p11), %s2738_s1, 256, %s2374_s28, [#allocation6], %s2269_s15, %s2269_s15, %s2270_s16  }
  0x28   : > { %s2137_s7 = scalar_lea.hbm %s2740_s3, 256 }
  0x29   : > { %p2138_p2 = scmp.ne.s32.totalorder %s2740_s3, %s2137_s7  ;;  %p2144_p10 = scmp.lt.u32.totalorder %s2137_s7, %s2740_s3 }
  0x2b   : > { %p2140_p1 = pnand %p2138_p2, %p2111_p13 }
  0x2d   : > { %p2141_p6 = pneg %p2140_p1 }
  0x2f   : > { %p2146_p3 = pnand %p2144_p10, %p2141_p6 }
  0x31   : > { %2149 = shalt.err (!%p2146_p3)
}
  0x32   : > { %s2150_s28 = scalar_lea.vmem %s2385_s6, 256  ;;  %p2158_p12 = scmp.lt.s32.totalorder %s2385_s6, %s2385_s6 }
  0x33   : > { %p2151_p5 = scmp.ne.s32.totalorder %s2385_s6, %s2150_s28  ;;  %p2159_p0 = scmp.lt.s32.totalorder %s2150_s28, %s2150_s28 }
  0x35   : > { %p2153_p7 = pnand %p2151_p5, %p2111_p13  ;;  %p2160_p2 = por %p2159_p0, %p2158_p12 }
  0x37   : > { %p2154_p9 = pneg %p2153_p7 }
  0x39   : > { %p2161_p1 = pnand %p2160_p2, %p2154_p9 }
  0x3b   : > { %2164 = shalt.err (!%p2161_p1)
}
  0x3c   : > { %s2271_s12 = smov 32   ;;  %s2272_s13 = smov 2  }
  0x3d   : > { %1997 = dma.hbm_to_vmem [thread:$0]  (!%p2381_p11), %s2740_s3, 256, %s2385_s6, [#allocation6], %s2271_s12, %s2271_s12, %s2272_s13  }
  0x3e   : > { %s2440_s16 = sadd.s32 1, %s2265_s21   ;;  %s29_s23 = sadd.s32 1, %s2261_s20 }
  0x3f   : > { %s26_s17 = ssub.s32 %s2265_s21, %s2440_s16  ;;  %p36_p6 = scmp.ne.s32.totalorder %s2261_s20, %s2257_s19 }
  0x40   : > { %p27_p13 = scmp.eq.s32.totalorder %s26_s17, 0  ;;  %p37_p10 = scmp.eq.s32.totalorder %s2265_s21, 0 }
  0x41   : > { %p2750_p5 = scmp.eq.s32.totalorder %s2351_s22, 1  ;;  %p2008_p9 = scmp.lt.s32.totalorder %s2265_s21, 2 }
  0x42   : > { %s2449_s27 = scalar_select %p27_p13, %s2261_s20, %s29_s23  }
  0x43   : > { %p38_p3 = por %p37_p10, %p36_p6  ;;  %p2453_p7 = por %p2750_p5, %p36_p6 }
  0x44   : > { %s208_s29 = sand.u32 1, %s2261_s20   ;;  %s1737_s6 = sshll.u32 %s2265_s21, 6 }
  0x45   : > { %s2751_s30 = scalar_select %p2453_p7, 1, 0 }
  0x46   : > { %s1736_s7 = sshll.u32 %s208_s29, 2  ;;  %s2463_s10 = scalar_lea.hbm %s2737_s0, %s1737_s6 }
  0x47   : > { %s212_s11 = scalar_lea.vmem [#allocation2], %s1736_s7  ;;  %p2467_p11 = pnand %p2008_p9, %p38_p3 }
  0x48   : > { %s219_s28 = sshll.u32 %s212_s11, 4  ;;  %s209_s13 = scalar_lea.sflag [#allocation3], %s208_s29  ;;  %s2465_s28 = int_to_ptr.vmem [resolvable:$true] %s219_s28 }
  0x49   : > { %s2165_s14 = scalar_lea.hbm %s2463_s10, 64  ;;  %p2167_p0 = pneg %p2467_p11 }
  0x4a   : > { %p2166_p12 = scmp.ne.s32.totalorder %s2463_s10, %s2165_s14  ;;  %s2170_s23 = scalar_lea.hbm %s2737_s0, 128 }
  0x4b   : > { %p2171_p13 = scmp.lt.u32.totalorder %s2463_s10, %s2737_s0  ;;  %p2172_p6 = scmp.lt.u32.totalorder %s2170_s23, %s2165_s14 }
  0x4c   : > { %p2168_p2 = pnand %p2167_p0, %p2166_p12  ;;  %p2174_p3 = scmp.lt.u32.totalorder %s2165_s14, %s2463_s10 }
  0x4d   : > { %p2173_p10 = por %p2172_p6, %p2171_p13 }
  0x4e   : > { %p2169_p1 = pneg %p2168_p2 }
  0x4f   : > { %p2175_p5 = por %p2174_p3, %p2173_p10 }
  0x51   : > { %p2176_p9 = pnand %p2175_p5, %p2169_p1 }
  0x53   : > { %2179 = shalt.err (!%p2176_p9)
}
  0x54   : > { %s2180_s29 = scalar_lea.vmem %s2465_s28, 64  ;;  %s2273_s8 = smov [#allocation2]  }
  0x55   : > { %p2181_p12 = scmp.ne.s32.totalorder %s2465_s28, %s2180_s29  ;;  %s2185_s9 = sshll.u32 %s2273_s8, 4  ;;  %s2186_s9 = int_to_ptr.vmem [resolvable:$false] %s2185_s9 }
  0x56   : > { %s2187_s11 = scalar_lea.vmem %s2186_s9, 128  ;;  %p2188_p4 = scmp.lt.s32.totalorder %s2465_s28, %s2186_s9 }
  0x57   : > { %p2183_p2 = pnand %p2181_p12, %p2167_p0  ;;  %p2189_p13 = scmp.lt.s32.totalorder %s2187_s11, %s2180_s29 }
  0x59   : > { %p2184_p7 = pneg %p2183_p2  ;;  %p2190_p6 = por %p2189_p13, %p2188_p4 }
  0x5b   : > { %p2191_p10 = pnand %p2190_p6, %p2184_p7 }
  0x5d   : > { %2194 = shalt.err (!%p2191_p10)
}
  0x5e   : > { %2001 = dma.hbm_to_vmem [thread:$0]  (!%p2467_p11), %s2463_s10, 64, %s2465_s28, %s209_s13  }
  0x5f   : > { %228 = sbr.rel (%p2370_p8) target bundleno = 4865 (0x1301), region = 40  ;;  %s2499_s14 = sand.u32 (!%p2370_p8), 1, %s2257_s19  }
  0x60   : > { %s1739_s15 = sshll.u32 (!%p2370_p8), %s2499_s14, 2  ;;  %s231_s17 = scalar_lea.sflag (!%p2370_p8), [#allocation3], %s2499_s14 }
  0x61   : > { %s234_s23 = scalar_lea.vmem (!%p2370_p8), [#allocation2], %s1739_s15  ;;  %p2753_p4 = scmp.ne.s32.totalorder (!%p2370_p8), %s2746_s24, 0 }
  0x66   : > { %2240 = dma.done.wait (%p2753_p4), %s231_s17, 64  }
  0x67   : > { %2242 = vsyncadd (%p2753_p4), %s231_s17, 4294967232  ;;  %p2754_p7 = scmp.eq.s32.totalorder %s2351_s22, 0 }
  0x69   : > { %2244 = dma.done.wait (%p2754_p7), [#allocation6], 512   ;;  %p2755_p11 = pmov %p2754_p7 }
  0x6a   : > { %v2274_v0 = vmov 0.0   ;;  %vm2275_vm0 = vmmov 0   ;;  %v2075_v1 = vld [vmem:[#allocation5] sm:$0xff]   ;;  %v2076_v2 = vld [vmem:[#allocation5 + $0x8] sm:$0xff]   ;;  %v270_v3 = vld [vmem:[%s234_s23] sm:$0xf] }
  0x6b   : > { %2246 = vsyncadd (%p2755_p11), [#allocation6], 4294966784  ;;  %1827 = vmatprep.subr.bf16.mxu0 %v2274_v0  ;;  %1831 = vmatprep.mubr.msk.bf16.mxu0 %vm2275_vm0, %v2274_v0  ;;  %vm294_vm1 = vcmask 261120   ;;  %v1743_v4 = vld [vmem:[%s2739_s2] ss:$0 sm:$0xff]  ;;  %s2276_s10 = smov 124  }
  0x6c   : > { %1835 = vmatprep.subr.bf16.mxu1 %v2274_v0  ;;  %1837 = vmatprep.mubr.msk.bf16.mxu1 %vm2275_vm0, %v2274_v0  ;;  %s2277_s28 = smov 96   ;;  %s2278_s12 = smov 92   ;;  %vm343_vm2 = vcmask 31744   ;;  %vm390_vm3 = vcmask 64512   ;;  %vm408_vm4 = vcmask 1043456   ;;  %vm570_vm5 = vcmask 1041408  }
  0x6d   : > { %1828 = vmatpush3.bf16.msra.mxu0 %v2075_v1  ;;  %s2279_s13 = smov 64   ;;  %s2280_s7 = smov 60   ;;  %v453_v48 = vld [vmem:[#allocation7] sm:$0x3]  ;;  %v566_v50 = vld [vmem:[#allocation7 + $0x2] sm:$0x3] }
  0x6e   : > { %1829 = vmatprep.subr.bf16.mxu0 %v2274_v0  ;;  %s2281_s6 = smov 120   ;;  %s2282_s29 = smov 88   ;;  %v618_v49 = vsel %vm570_vm5, %v453_v48, 0  ;;  %v572_v51 = vsel %vm570_vm5, %v566_v50, 0 }
  0x6f   : > { %s2283_s8 = smov 84   ;;  %s2284_s9 = smov 116  }
  0x70   : > { %s2285_s11 = smov 56   ;;  %s2286_s15 = smov 52  }
  0x71   : > { %1830 = vmatpush3.bf16.msra.mxu0 %v2076_v2  ;;  %s2287_s17 = smov 112   ;;  %s2288_s23 = smov 80  }
  0x72   : > { %1841 = vmatprep.subr.bf16.mxu0 %v2274_v0  ;;  %s2289_s24 = smov 76   ;;  %s2290_s26 = smov 108  }
  0x73   : > { %p2756_p0 = scmp.ne.s32.totalorder %s2751_s30, 0 }
  0x74   : > { %1832 = vmatmul.mubr.msk.bf16.vlgmr.msra.gmra.mrb[0].mxu0 %vm294_vm1, %v270_v3 }
  0x75   : > { %1843 = vmatprep.mubr.msk.bf16.mxu0 %vm2275_vm0, %v2274_v0 }
 0x147   : > { %v332_v5 = vpop.f32.mrb[0].mxu0 }
 0x148   : > { %v333_v6 = vadd.f32 %v1743_v4, %v332_v5  ;;  %v1833_v7 = vpop.f32.mrb[1].mxu0 }
 0x149   : > { %v335_v8 = vpop.f32.mrb[2].mxu0 }
 0x14a   : > { %v2525_v9 = vpack.c.bf16 %v333_v6, %v333_v6  ;;  %v1834_v10 = vpop.f32.mrb[3].mxu0 }
 0x14c   : > { %454 = vrot.lane.b32.xlu1 %v2525_v9, %s2276_s10  ;;  %341 = vrot.lane.b32.xlu0 %v2525_v9, %s2277_s28  ;;  %s2291_s10 = smov 48   ;;  %s2292_s28 = smov 44  }
 0x150   : > { %456 = vrot.lane.b32.xlu0 %v2525_v9, %s2278_s12  ;;  %s2293_s12 = smov 104  }
 0x1be   : > { %v342_v11 = vpop.permute.xlu0 %341  ;;  %v455_v15 = vpop.permute.xlu1 %454 }
 0x1bf   : > { %v348_v12 = vsel %vm343_vm2, %v342_v11, 0 }
 0x1c0   : > { %1836 = vmatpush3.bf16.xpose.msra.mxu1 %v348_v12 }
 0x1c1   : > { %1847 = vmatprep.subr.bf16.mxu1 %v2274_v0 }
 0x1c2   : > { %v457_v13 = vpop.permute.xlu0 %456 }
 0x1c3   : > { %v462_v14 = vsel %vm343_vm2, %v457_v13, 0 }
 0x1c7   : > { %1838 = vmatmul.mubr.msk.bf16.vlgmr.msra.gmra.mrb[0].mxu1 %vm343_vm2, %v2525_v9 }
 0x1c8   : > { %1848 = vmatpush3.bf16.xpose.msra.mxu1 %v462_v14  ;;  %1849 = vmatprep.mubr.msk.bf16.mxu1 %vm2275_vm0, %v2274_v0 }
 0x1c9   : > { %1859 = vmatprep.subr.bf16.mxu1 %v2274_v0 }
 0x1cf   : > { %1850 = vmatmul.mubr.msk.bf16.vlgmr.msra.gmra.mrb[4].mxu1 %vm343_vm2, %v455_v15 }
 0x1d0   : > { %1861 = vmatprep.mubr.msk.bf16.mxu1 %vm2275_vm0, %v2274_v0  ;;  %1860 = vmatpush3.bf16.msra.mxu1 %v572_v51 }
 0x1d1   : > { %1871 = vmatprep.subr.bf16.mxu1 %v2274_v0 }
 0x29a   : > { %v384_v16 = vpop.f32.mrb[0].mxu1 }
 0x29b   : > { %v1839_v17 = vpop.f32.mrb[1].mxu1  ;;  %v391_v18 = vsel %vm390_vm3, %v384_v16, -inf }
 0x29c   : > { %392 = vmax.xlane.f32.xlu1 %v391_v18  ;;  %v387_v19 = vpop.f32.mrb[2].mxu1 }
 0x29d   : > { %v1840_v20 = vpop.f32.mrb[3].mxu1 }
 0x2a2   : > { %v498_v21 = vpop.f32.mrb[4].mxu1 }
 0x2a3   : > { %v1851_v22 = vpop.f32.mrb[5].mxu1  ;;  %v504_v23 = vsel %vm390_vm3, %v498_v21, -inf }
 0x2a4   : > { %505 = vmax.xlane.f32.xlu0 %v504_v23  ;;  %v501_v24 = vpop.f32.mrb[6].mxu1 }
 0x2a5   : > { %v1852_v25 = vpop.f32.mrb[7].mxu1 }
 0x329   : > { %v393_v26 = vpop.xlane.xlu1 %392 }
 0x32a   : > { %v394_v27 = vsub.f32 %v384_v16, %v393_v26 }
 0x32c   : > { %v395_v28 = vmul.f32 1.442695, %v394_v27 }
 0x32e   : > { %2077 = vpow2.f32 %v395_v28 }
 0x331   : > { %v506_v29 = vpop.xlane.xlu0 %505 }
 0x332   : > { %v507_v30 = vsub.f32 %v498_v21, %v506_v29 }
 0x334   : > { %v508_v31 = vmul.f32 1.442695, %v507_v30 }
 0x336   : > { %2079 = vpow2.f32 %v508_v31  ;;  %v772_v31 = vld [vmem:[#allocation7 + $0x4] sm:$0x3] }
 0x338   : > { %v2078_v32 = vpop.eup %2077 }
 0x339   : > { %v397_v33 = vsel %vm390_vm3, %v2078_v32, 0.0 }
 0x33a   : > { %398 = vadd.xlane.f32.xlu0 %v397_v33 }
 0x340   : > { %v2080_v34 = vpop.eup %2079 }
 0x341   : > { %v510_v35 = vsel %vm390_vm3, %v2080_v34, 0.0 }
 0x342   : > { %511 = vadd.xlane.f32.xlu1 %v510_v35 }
 0x350   : > { %403 = vrot.lane.b32.xlu0 %v2525_v9, %s2279_s13  ;;  %s2294_s13 = smov 72  }
 0x353   : > { %516 = vrot.lane.b32.xlu1 %v2525_v9, %s2280_s7  ;;  %s2295_s7 = smov 68  }
 0x354   : > { %660 = vrot.lane.b32.xlu0 %v2525_v9, %s2281_s6  ;;  %s2296_s6 = smov 100  }
 0x357   : > { %662 = vrot.lane.b32.xlu1 %v2525_v9, %s2282_s29  ;;  %s2297_s29 = smov 40  }
 0x3c7   : > { %v399_v36 = vpop.xlane.xlu0 %398 }
 0x3c8   : > { %2081 = vrcp.f32 %v399_v36 }
 0x3cb   : > { %v404_v37 = vpop.permute.xlu0 %403 }
 0x3cc   : > { %v410_v38 = vsel %vm408_vm4, %v404_v37, 0 }
 0x3cd   : > { %1842 = vmatpush3.bf16.msra.mxu0 %v410_v38 }
 0x3ce   : > { %1853 = vmatprep.subr.bf16.mxu0 %v2274_v0 }
 0x3cf   : > { %v512_v39 = vpop.xlane.xlu1 %511  ;;  %v661_v1 = vpop.permute.xlu0 %660 }
 0x3d0   : > { %2083 = vrcp.f32 %v512_v39 }
 0x3d2   : > { %v2082_v40 = vpop.eup %2081 }
 0x3d3   : > { %v401_v41 = vmul.f32 %v2082_v40, %v2078_v32  ;;  %v517_v42 = vpop.permute.xlu1 %516  ;;  %v777_v32 = vsel %vm570_vm5, %v772_v31, 0  ;;  %v1092_v31 = vld [vmem:[#allocation7 + $0x8] sm:$0x3] }
 0x3d4   : > { %v522_v44 = vsel %vm408_vm4, %v517_v42, 0 }
 0x3d5   : > { %v402_v43 = vpack.c.bf16 %v401_v41, %v401_v41 }
 0x3d7   : > { %1844 = vmatmul.mubr.msk.bf16.vlgmr.msra.gmra.mrb[4].mxu0 %vm390_vm3, %v402_v43  ;;  %v663_v57 = vpop.permute.xlu1 %662 }
 0x3d8   : > { %1854 = vmatpush3.bf16.msra.mxu0 %v522_v44  ;;  %1855 = vmatprep.mubr.msk.bf16.mxu0 %vm2275_vm0, %v2274_v0  ;;  %v668_v62 = vsel %vm343_vm2, %v663_v57, 0 }
 0x3d9   : > { %1865 = vmatprep.subr.bf16.mxu0 %v2274_v0 }
 0x3da   : > { %v2084_v45 = vpop.eup %2083 }
 0x3db   : > { %v514_v46 = vmul.f32 %v2084_v45, %v2080_v34 }
 0x3dd   : > { %v515_v47 = vpack.c.bf16 %v514_v46, %v514_v46 }
 0x3df   : > { %1856 = vmatmul.mubr.msk.bf16.vlgmr.msra.gmra.mrb[8].mxu0 %vm390_vm3, %v515_v47 }
 0x3e0   : > { %1867 = vmatprep.mubr.msk.bf16.mxu0 %vm2275_vm0, %v2274_v0  ;;  %1866 = vmatpush3.bf16.msra.mxu0 %v618_v49 }
 0x3e1   : > { %1877 = vmatprep.subr.bf16.mxu0 %v2274_v0 }
 0x4aa   : > { %v446_v52 = vpop.f32.mrb[4].mxu0 }
 0x4ab   : > { %v452_v53 = vpack.c.bf16 %v446_v52, %v446_v52  ;;  %v1845_v54 = vpop.f32.mrb[5].mxu0 }
 0x4ac   : > { %v449_v55 = vpop.f32.mrb[6].mxu0 }
 0x4ad   : > { %v1846_v56 = vpop.f32.mrb[7].mxu0  ;;  %1868 = vmatmul.mubr.msk.bf16.vlgmr.msra.gmra.mrb[12].mxu0 %vm343_vm2, %v452_v53 }
 0x4ae   : > { %1879 = vmatprep.mubr.msk.bf16.mxu0 %vm2275_vm0, %v2274_v0 }
 0x4b2   : > { %v558_v58 = vpop.f32.mrb[8].mxu0 }
 0x4b3   : > { %v564_v59 = vpack.c.bf16 %v558_v58, %v558_v58  ;;  %v1857_v60 = vpop.f32.mrb[9].mxu0 }
 0x4b4   : > { %v561_v61 = vpop.f32.mrb[10].mxu0 }
 0x4b5   : > { %v1858_v63 = vpop.f32.mrb[11].mxu0  ;;  %1862 = vmatmul.mubr.msk.bf16.vlgmr.msra.gmra.mrb[8].mxu1 %vm343_vm2, %v564_v59 }
 0x4b6   : > { %1872 = vmatpush3.bf16.xpose.msra.mxu1 %v668_v62  ;;  %1873 = vmatprep.mubr.msk.bf16.mxu1 %vm2275_vm0, %v2274_v0  ;;  %v932_v62 = vld [vmem:[#allocation7 + $0x6] sm:$0x3] }
 0x4b7   : > { %1883 = vmatprep.subr.bf16.mxu1 %v2274_v0  ;;  %v937_v63 = vsel %vm570_vm5, %v932_v62, 0  ;;  %v1252_v62 = vld [vmem:[#allocation7 + $0xa] sm:$0x3] }
 0x4bd   : > { %1874 = vmatmul.mubr.msk.bf16.vlgmr.msra.gmra.mrb[12].mxu1 %vm343_vm2, %v661_v1 }
 0x4be   : > { %1885 = vmatprep.mubr.msk.bf16.mxu1 %vm2275_vm0, %v2274_v0  ;;  %1884 = vmatpush3.bf16.msra.mxu1 %v777_v32  ;;  %v1097_v32 = vsel %vm570_vm5, %v1092_v31, 0  ;;  %v1412_v31 = vld [vmem:[#allocation7 + $0xc] sm:$0x3] }
 0x4bf   : > { %1895 = vmatprep.subr.bf16.mxu1 %v2274_v0 }
 0x580   : > { %v654_v2 = vpop.f32.mrb[12].mxu0 }
 0x581   : > { %v1869_v3 = vpop.f32.mrb[13].mxu0 }
 0x582   : > { %v657_v4 = vpop.f32.mrb[14].mxu0 }
 0x583   : > { %v1870_v5 = vpop.f32.mrb[15].mxu0 }
 0x588   : > { %v608_v6 = vpop.f32.mrb[8].mxu1 }
 0x589   : > { %v2574_v7 = vadd.f32 %v654_v2, %v608_v6  ;;  %v1863_v8 = vpop.f32.mrb[9].mxu1 }
 0x58a   : > { %v611_v10 = vpop.f32.mrb[10].mxu1 }
 0x58b   : > { %v1864_v11 = vpop.f32.mrb[11].mxu1 }
 0x590   : > { %v704_v12 = vpop.f32.mrb[12].mxu1 }
 0x591   : > { %v1875_v13 = vpop.f32.mrb[13].mxu1  ;;  %v710_v14 = vsel %vm390_vm3, %v704_v12, -inf }
 0x592   : > { %711 = vmax.xlane.f32.xlu1 %v710_v14  ;;  %v707_v15 = vpop.f32.mrb[14].mxu1 }
 0x593   : > { %v1876_v16 = vpop.f32.mrb[15].mxu1 }
 0x5a3   : > { %822 = vrot.lane.b32.xlu1 %v2525_v9, %s2283_s8  ;;  %s2298_s8 = smov 36  }
 0x5a7   : > { %820 = vrot.lane.b32.xlu1 %v2525_v9, %s2284_s9  ;;  %s1742_s9 = sshll.u32 %s2499_s14, 3 }
 0x61f   : > { %v712_v17 = vpop.xlane.xlu1 %711 }
 0x620   : > { %v713_v18 = vsub.f32 %v704_v12, %v712_v17 }
 0x622   : > { %v714_v19 = vmul.f32 1.442695, %v713_v18 }
 0x623   : > { %v823_v27 = vpop.permute.xlu1 %822 }
 0x624   : > { %2085 = vpow2.f32 %v714_v19  ;;  %v828_v29 = vsel %vm343_vm2, %v823_v27, 0 }
 0x627   : > { %v821_v30 = vpop.permute.xlu1 %820 }
 0x62e   : > { %v2086_v20 = vpop.eup %2085 }
 0x62f   : > { %v716_v21 = vsel %vm390_vm3, %v2086_v20, 0.0 }
 0x630   : > { %717 = vadd.xlane.f32.xlu0 %v716_v21 }
 0x646   : > { %722 = vrot.lane.b32.xlu0 %v2525_v9, %s2285_s11 }
 0x6bd   : > { %v718_v22 = vpop.xlane.xlu0 %717 }
 0x6be   : > { %2087 = vrcp.f32 %v718_v22 }
 0x6c1   : > { %v723_v23 = vpop.permute.xlu0 %722 }
 0x6c2   : > { %v728_v24 = vsel %vm408_vm4, %v723_v23, 0 }
 0x6c3   : > { %1878 = vmatpush3.bf16.msra.mxu0 %v728_v24 }
 0x6c4   : > { %1889 = vmatprep.subr.bf16.mxu0 %v2274_v0 }
 0x6c8   : > { %v2088_v25 = vpop.eup %2087 }
 0x6c9   : > { %v720_v26 = vmul.f32 %v2088_v25, %v2086_v20 }
 0x6cb   : > { %v721_v28 = vpack.c.bf16 %v720_v26, %v720_v26 }
 0x6cd   : > { %1880 = vmatmul.mubr.msk.bf16.vlgmr.msra.gmra.mrb[16].mxu0 %vm390_vm3, %v721_v28 }
 0x6ce   : > { %1890 = vmatpush3.bf16.xpose.msra.mxu0 %v828_v29  ;;  %1891 = vmatprep.mubr.msk.bf16.mxu0 %vm2275_vm0, %v2274_v0 }
 0x6cf   : > { %1901 = vmatprep.subr.bf16.mxu0 %v2274_v0 }
 0x6d5   : > { %1892 = vmatmul.mubr.msk.bf16.vlgmr.msra.gmra.mrb[20].mxu0 %vm343_vm2, %v821_v30 }
 0x6d6   : > { %1903 = vmatprep.mubr.msk.bf16.mxu0 %vm2275_vm0, %v2274_v0  ;;  %1902 = vmatpush3.bf16.msra.mxu0 %v937_v63  ;;  %v1257_v63 = vsel %vm570_vm5, %v1252_v62, 0 }
 0x6d7   : > { %1913 = vmatprep.subr.bf16.mxu0 %v2274_v0 }
 0x7a0   : > { %v764_v33 = vpop.f32.mrb[16].mxu0 }
 0x7a1   : > { %v770_v34 = vpack.c.bf16 %v764_v33, %v764_v33  ;;  %v1881_v35 = vpop.f32.mrb[17].mxu0 }
 0x7a2   : > { %v767_v36 = vpop.f32.mrb[18].mxu0 }
 0x7a3   : > { %v1882_v37 = vpop.f32.mrb[19].mxu0  ;;  %1886 = vmatmul.mubr.msk.bf16.vlgmr.msra.gmra.mrb[16].mxu1 %vm343_vm2, %v770_v34 }
 0x7a4   : > { %1897 = vmatprep.mubr.msk.bf16.mxu1 %vm2275_vm0, %v2274_v0 }
 0x7a8   : > { %v864_v38 = vpop.f32.mrb[20].mxu0 }
 0x7a9   : > { %v1893_v39 = vpop.f32.mrb[21].mxu0  ;;  %v870_v40 = vsel %vm390_vm3, %v864_v38, -inf }
 0x7aa   : > { %871 = vmax.xlane.f32.xlu0 %v870_v40  ;;  %v867_v41 = vpop.f32.mrb[22].mxu0 }
 0x7ab   : > { %v1894_v42 = vpop.f32.mrb[23].mxu0 }
 0x7c0   : > { %882 = vrot.lane.b32.xlu0 %v2525_v9, %s2286_s15 }
 0x7c4   : > { %980 = vrot.lane.b32.xlu0 %v2525_v9, %s2287_s17  ;;  %s1773_s17 = sshll.u32 %s2351_s22, 7  ;;  %s1629_s22 = scalar_lea.sflag [#allocation4], %s2499_s14 }
 0x837   : > { %v872_v43 = vpop.xlane.xlu0 %871 }
 0x838   : > { %v873_v44 = vsub.f32 %v864_v38, %v872_v43 }
 0x83a   : > { %v874_v45 = vmul.f32 1.442695, %v873_v44 }
 0x83b   : > { %v883_v46 = vpop.permute.xlu0 %882 }
 0x83c   : > { %2089 = vpow2.f32 %v874_v45  ;;  %v888_v47 = vsel %vm408_vm4, %v883_v46, 0 }
 0x83d   : > { %1896 = vmatpush3.bf16.msra.mxu1 %v888_v47 }
 0x83e   : > { %1907 = vmatprep.subr.bf16.mxu1 %v2274_v0 }
 0x83f   : > { %v981_v61 = vpop.permute.xlu0 %980 }
 0x846   : > { %v2090_v48 = vpop.eup %2089 }
 0x847   : > { %v876_v49 = vsel %vm390_vm3, %v2090_v48, 0.0 }
 0x848   : > { %877 = vadd.xlane.f32.xlu1 %v876_v49 }
 0x859   : > { %982 = vrot.lane.b32.xlu1 %v2525_v9, %s2288_s23  ;;  %s268_s23 = scalar_lea.vmem [#allocation8], %s1742_s9 }
 0x876   : > { %v813_v50 = vpop.f32.mrb[16].mxu1 }
 0x877   : > { %v819_v51 = vadd.f32 %v813_v50, %v2574_v7  ;;  %v1887_v52 = vpop.f32.mrb[17].mxu1 }
 0x878   : > { %v816_v53 = vpop.f32.mrb[18].mxu1 }
 0x879   : > { %v1888_v54 = vpop.f32.mrb[19].mxu1 }
 0x8d5   : > { %v878_v55 = vpop.xlane.xlu1 %877 }
 0x8d6   : > { %2091 = vrcp.f32 %v878_v55 }
 0x8d9   : > { %v983_v58 = vpop.permute.xlu1 %982 }
 0x8da   : > { %v988_v60 = vsel %vm343_vm2, %v983_v58, 0 }
 0x8e0   : > { %v2092_v56 = vpop.eup %2091 }
 0x8e1   : > { %v880_v57 = vmul.f32 %v2092_v56, %v2090_v48 }
 0x8e3   : > { %v881_v59 = vpack.c.bf16 %v880_v57, %v880_v57 }
 0x8e5   : > { %1898 = vmatmul.mubr.msk.bf16.vlgmr.msra.gmra.mrb[20].mxu1 %vm390_vm3, %v881_v59 }
 0x8e6   : > { %1908 = vmatpush3.bf16.xpose.msra.mxu1 %v988_v60  ;;  %1909 = vmatprep.mubr.msk.bf16.mxu1 %vm2275_vm0, %v2274_v0 }
 0x8e7   : > { %1919 = vmatprep.subr.bf16.mxu1 %v2274_v0 }
 0x8ed   : > { %1910 = vmatmul.mubr.msk.bf16.vlgmr.msra.gmra.mrb[24].mxu1 %vm343_vm2, %v981_v61 }
 0x8ee   : > { %1921 = vmatprep.mubr.msk.bf16.mxu1 %vm2275_vm0, %v2274_v0  ;;  %1920 = vmatpush3.bf16.msra.mxu1 %v1097_v32  ;;  %v1417_v32 = vsel %vm570_vm5, %v1412_v31, 0 }
 0x8ef   : > { %1931 = vmatprep.subr.bf16.mxu1 %v2274_v0 }
 0x9b8   : > { %v924_v1 = vpop.f32.mrb[20].mxu1 }
 0x9b9   : > { %v930_v2 = vpack.c.bf16 %v924_v1, %v924_v1  ;;  %v1899_v3 = vpop.f32.mrb[21].mxu1 }
 0x9ba   : > { %v927_v4 = vpop.f32.mrb[22].mxu1 }
 0x9bb   : > { %v1900_v5 = vpop.f32.mrb[23].mxu1  ;;  %1904 = vmatmul.mubr.msk.bf16.vlgmr.msra.gmra.mrb[24].mxu0 %vm343_vm2, %v930_v2 }
 0x9bc   : > { %1915 = vmatprep.mubr.msk.bf16.mxu0 %vm2275_vm0, %v2274_v0 }
 0x9c0   : > { %v1024_v6 = vpop.f32.mrb[24].mxu1 }
 0x9c1   : > { %v1911_v7 = vpop.f32.mrb[25].mxu1  ;;  %v1030_v8 = vsel %vm390_vm3, %v1024_v6, -inf }
 0x9c2   : > { %1031 = vmax.xlane.f32.xlu1 %v1030_v8  ;;  %v1027_v10 = vpop.f32.mrb[26].mxu1 }
 0x9c3   : > { %v1912_v11 = vpop.f32.mrb[27].mxu1 }
 0x9d3   : > { %1142 = vrot.lane.b32.xlu1 %v2525_v9, %s2289_s24  ;;  %s1642_s24 = sshll.u32 %s268_s23, 4  ;;  %s2694_s24 = int_to_ptr.vmem [resolvable:$true] %s1642_s24 }
 0x9d7   : > { %1140 = vrot.lane.b32.xlu1 %v2525_v9, %s2290_s26 }
 0xa4f   : > { %v1032_v12 = vpop.xlane.xlu1 %1031 }
 0xa50   : > { %v1033_v13 = vsub.f32 %v1024_v6, %v1032_v12 }
 0xa52   : > { %v1034_v14 = vmul.f32 1.442695, %v1033_v13 }
 0xa53   : > { %v1143_v27 = vpop.permute.xlu1 %1142 }
 0xa54   : > { %2093 = vpow2.f32 %v1034_v14  ;;  %v1148_v29 = vsel %vm343_vm2, %v1143_v27, 0 }
 0xa57   : > { %v1141_v30 = vpop.permute.xlu1 %1140 }
 0xa5e   : > { %v2094_v15 = vpop.eup %2093 }
 0xa5f   : > { %v1036_v16 = vsel %vm390_vm3, %v2094_v15, 0.0 }
 0xa60   : > { %1037 = vadd.xlane.f32.xlu0 %v1036_v16 }
 0xa76   : > { %1042 = vrot.lane.b32.xlu0 %v2525_v9, %s2291_s10 }
 0xa8e   : > { %v973_v17 = vpop.f32.mrb[24].mxu0 }
 0xa8f   : > { %v979_v18 = vadd.f32 %v973_v17, %v819_v51  ;;  %v1905_v19 = vpop.f32.mrb[25].mxu0 }
 0xa90   : > { %v976_v20 = vpop.f32.mrb[26].mxu0 }
 0xa91   : > { %v1906_v21 = vpop.f32.mrb[27].mxu0 }
 0xaed   : > { %v1038_v22 = vpop.xlane.xlu0 %1037 }
 0xaee   : > { %2095 = vrcp.f32 %v1038_v22 }
 0xaf1   : > { %v1043_v23 = vpop.permute.xlu0 %1042 }
 0xaf2   : > { %v1048_v24 = vsel %vm408_vm4, %v1043_v23, 0 }
 0xaf3   : > { %1914 = vmatpush3.bf16.msra.mxu0 %v1048_v24 }
 0xaf4   : > { %1925 = vmatprep.subr.bf16.mxu0 %v2274_v0 }
 0xaf8   : > { %v2096_v25 = vpop.eup %2095 }
 0xaf9   : > { %v1040_v26 = vmul.f32 %v2096_v25, %v2094_v15 }
 0xafb   : > { %v1041_v28 = vpack.c.bf16 %v1040_v26, %v1040_v26 }
 0xafd   : > { %1916 = vmatmul.mubr.msk.bf16.vlgmr.msra.gmra.mrb[28].mxu0 %vm390_vm3, %v1041_v28 }
 0xafe   : > { %1926 = vmatpush3.bf16.xpose.msra.mxu0 %v1148_v29  ;;  %1927 = vmatprep.mubr.msk.bf16.mxu0 %vm2275_vm0, %v2274_v0 }
 0xaff   : > { %1937 = vmatprep.subr.bf16.mxu0 %v2274_v0 }
 0xb05   : > { %1928 = vmatmul.mubr.msk.bf16.vlgmr.msra.gmra.mrb[32].mxu0 %vm343_vm2, %v1141_v30 }
 0xb06   : > { %1939 = vmatprep.mubr.msk.bf16.mxu0 %vm2275_vm0, %v2274_v0  ;;  %1938 = vmatpush3.bf16.msra.mxu0 %v1257_v63 }
 0xb07   : > { %1949 = vmatprep.subr.bf16.mxu0 %v2274_v0 }
 0xbd0   : > { %v1084_v33 = vpop.f32.mrb[28].mxu0 }
 0xbd1   : > { %v1090_v34 = vpack.c.bf16 %v1084_v33, %v1084_v33  ;;  %v1917_v35 = vpop.f32.mrb[29].mxu0 }
 0xbd2   : > { %v1087_v36 = vpop.f32.mrb[30].mxu0 }
 0xbd3   : > { %v1918_v37 = vpop.f32.mrb[31].mxu0  ;;  %1922 = vmatmul.mubr.msk.bf16.vlgmr.msra.gmra.mrb[28].mxu1 %vm343_vm2, %v1090_v34 }
 0xbd4   : > { %1933 = vmatprep.mubr.msk.bf16.mxu1 %vm2275_vm0, %v2274_v0 }
 0xbd8   : > { %v1184_v38 = vpop.f32.mrb[32].mxu0 }
 0xbd9   : > { %v1929_v39 = vpop.f32.mrb[33].mxu0  ;;  %v1190_v40 = vsel %vm390_vm3, %v1184_v38, -inf }
 0xbda   : > { %1191 = vmax.xlane.f32.xlu0 %v1190_v40  ;;  %v1187_v41 = vpop.f32.mrb[34].mxu0 }
 0xbdb   : > { %v1930_v42 = vpop.f32.mrb[35].mxu0 }
 0xbf0   : > { %1202 = vrot.lane.b32.xlu0 %v2525_v9, %s2292_s28  ;;  %s2692_s28 = scalar_lea.hbm %s2742_s5, %s1773_s17 }
 0xbf4   : > { %1300 = vrot.lane.b32.xlu0 %v2525_v9, %s2293_s12  ;;  %s2195_s12 = scalar_lea.vmem %s2694_s24, 128 }
 0xbf5   : > { %p2196_p8 = scmp.ne.s32.totalorder %s2694_s24, %s2195_s12 }
 0xbf7   : > { %p2197_p1 = pnand %p2196_p8, %p2756_p0 }
 0xbf9   : > { %p2198_p3 = pneg %p2197_p1 }
 0xc67   : > { %v1192_v43 = vpop.xlane.xlu0 %1191 }
 0xc68   : > { %v1193_v44 = vsub.f32 %v1184_v38, %v1192_v43 }
 0xc6a   : > { %v1194_v45 = vmul.f32 1.442695, %v1193_v44 }
 0xc6b   : > { %v1203_v46 = vpop.permute.xlu0 %1202 }
 0xc6c   : > { %2097 = vpow2.f32 %v1194_v45  ;;  %v1208_v47 = vsel %vm408_vm4, %v1203_v46, 0 }
 0xc6d   : > { %1932 = vmatpush3.bf16.msra.mxu1 %v1208_v47 }
 0xc6e   : > { %1943 = vmatprep.subr.bf16.mxu1 %v2274_v0 }
 0xc6f   : > { %v1301_v61 = vpop.permute.xlu0 %1300 }
 0xc76   : > { %v2098_v48 = vpop.eup %2097 }
 0xc77   : > { %v1196_v49 = vsel %vm390_vm3, %v2098_v48, 0.0 }
 0xc78   : > { %1197 = vadd.xlane.f32.xlu1 %v1196_v49  ;;  %v1572_v49 = vld [vmem:[#allocation7 + $0xe] sm:$0x3] }
 0xc89   : > { %1302 = vrot.lane.b32.xlu1 %v2525_v9, %s2294_s13  ;;  %s2299_s13 = smov [#allocation8]  }
 0xca6   : > { %v1133_v50 = vpop.f32.mrb[28].mxu1 }
 0xca7   : > { %v1139_v51 = vadd.f32 %v1133_v50, %v979_v18  ;;  %v1923_v52 = vpop.f32.mrb[29].mxu1  ;;  %v1577_v50 = vsel %vm570_vm5, %v1572_v49, 0 }
 0xca8   : > { %v1136_v53 = vpop.f32.mrb[30].mxu1 }
 0xca9   : > { %v1924_v54 = vpop.f32.mrb[31].mxu1 }
 0xd05   : > { %v1198_v55 = vpop.xlane.xlu1 %1197 }
 0xd06   : > { %2099 = vrcp.f32 %v1198_v55 }
 0xd09   : > { %v1303_v58 = vpop.permute.xlu1 %1302 }
 0xd0a   : > { %v1308_v60 = vsel %vm343_vm2, %v1303_v58, 0 }
 0xd10   : > { %v2100_v56 = vpop.eup %2099 }
 0xd11   : > { %v1200_v57 = vmul.f32 %v2100_v56, %v2098_v48 }
 0xd13   : > { %v1201_v59 = vpack.c.bf16 %v1200_v57, %v1200_v57 }
 0xd15   : > { %1934 = vmatmul.mubr.msk.bf16.vlgmr.msra.gmra.mrb[32].mxu1 %vm390_vm3, %v1201_v59 }
 0xd16   : > { %1944 = vmatpush3.bf16.xpose.msra.mxu1 %v1308_v60  ;;  %1945 = vmatprep.mubr.msk.bf16.mxu1 %vm2275_vm0, %v2274_v0 }
 0xd17   : > { %1955 = vmatprep.subr.bf16.mxu1 %v2274_v0 }
 0xd1d   : > { %1946 = vmatmul.mubr.msk.bf16.vlgmr.msra.gmra.mrb[36].mxu1 %vm343_vm2, %v1301_v61 }
 0xd1e   : > { %1957 = vmatprep.mubr.msk.bf16.mxu1 %vm2275_vm0, %v2274_v0  ;;  %1956 = vmatpush3.bf16.msra.mxu1 %v1417_v32 }
 0xd1f   : > { %1967 = vmatprep.subr.bf16.mxu1 %v2274_v0 }
 0xde8   : > { %v1244_v1 = vpop.f32.mrb[32].mxu1 }
 0xde9   : > { %v1250_v2 = vpack.c.bf16 %v1244_v1, %v1244_v1  ;;  %v1935_v3 = vpop.f32.mrb[33].mxu1  ;;  %v1771_v1 = vld [vmem:[%s2741_s4] ss:$0 sm:$0xff] }
 0xdea   : > { %v1247_v4 = vpop.f32.mrb[34].mxu1 }
 0xdeb   : > { %v1936_v5 = vpop.f32.mrb[35].mxu1  ;;  %1940 = vmatmul.mubr.msk.bf16.vlgmr.msra.gmra.mrb[36].mxu0 %vm343_vm2, %v1250_v2 }
 0xdec   : > { %1951 = vmatprep.mubr.msk.bf16.mxu0 %vm2275_vm0, %v2274_v0 }
 0xdf0   : > { %v1344_v6 = vpop.f32.mrb[36].mxu1 }
 0xdf1   : > { %v1947_v7 = vpop.f32.mrb[37].mxu1  ;;  %v1350_v8 = vsel %vm390_vm3, %v1344_v6, -inf }
 0xdf2   : > { %1351 = vmax.xlane.f32.xlu1 %v1350_v8  ;;  %v1347_v10 = vpop.f32.mrb[38].mxu1 }
 0xdf3   : > { %v1948_v11 = vpop.f32.mrb[39].mxu1 }
 0xe03   : > { %1462 = vrot.lane.b32.xlu1 %v2525_v9, %s2295_s7  ;;  %s2199_s7 = sshll.u32 %s2299_s13, 4  ;;  %s2200_s7 = int_to_ptr.vmem [resolvable:$false] %s2199_s7 }
 0xe04   : > { %p2202_p5 = scmp.lt.s32.totalorder %s2694_s24, %s2200_s7 }
 0xe07   : > { %1460 = vrot.lane.b32.xlu1 %v2525_v9, %s2296_s6  ;;  %s2201_s6 = scalar_lea.vmem %s2200_s7, 256 }
 0xe08   : > { %p2203_p9 = scmp.lt.s32.totalorder %s2201_s6, %s2195_s12 }
 0xe0a   : > { %p2204_p12 = por %p2203_p9, %p2202_p5 }
 0xe0c   : > { %p2205_p2 = pnand %p2204_p12, %p2198_p3 }
 0xe7f   : > { %v1352_v12 = vpop.xlane.xlu1 %1351 }
 0xe80   : > { %v1353_v13 = vsub.f32 %v1344_v6, %v1352_v12 }
 0xe82   : > { %v1354_v14 = vmul.f32 1.442695, %v1353_v13 }
 0xe83   : > { %v1463_v27 = vpop.permute.xlu1 %1462 }
 0xe84   : > { %2101 = vpow2.f32 %v1354_v14  ;;  %v1468_v29 = vsel %vm343_vm2, %v1463_v27, 0 }
 0xe87   : > { %v1461_v30 = vpop.permute.xlu1 %1460 }
 0xe8e   : > { %v2102_v15 = vpop.eup %2101 }
 0xe8f   : > { %v1356_v16 = vsel %vm390_vm3, %v2102_v15, 0.0 }
 0xe90   : > { %1357 = vadd.xlane.f32.xlu0 %v1356_v16 }
 0xea6   : > { %1362 = vrot.lane.b32.xlu0 %v2525_v9, %s2297_s29 }
 0xebe   : > { %v1293_v17 = vpop.f32.mrb[36].mxu0 }
 0xebf   : > { %v1299_v18 = vadd.f32 %v1293_v17, %v1139_v51  ;;  %v1941_v19 = vpop.f32.mrb[37].mxu0 }
 0xec0   : > { %v1296_v20 = vpop.f32.mrb[38].mxu0 }
 0xec1   : > { %v1942_v21 = vpop.f32.mrb[39].mxu0 }
 0xf1d   : > { %v1358_v22 = vpop.xlane.xlu0 %1357 }
 0xf1e   : > { %2103 = vrcp.f32 %v1358_v22 }
 0xf21   : > { %v1363_v23 = vpop.permute.xlu0 %1362 }
 0xf22   : > { %v1368_v24 = vsel %vm408_vm4, %v1363_v23, 0 }
 0xf23   : > { %1950 = vmatpush3.bf16.msra.mxu0 %v1368_v24 }
 0xf24   : > { %1961 = vmatprep.subr.bf16.mxu0 %v2274_v0 }
 0xf28   : > { %v2104_v25 = vpop.eup %2103 }
 0xf29   : > { %v1360_v26 = vmul.f32 %v2104_v25, %v2102_v15 }
 0xf2b   : > { %v1361_v28 = vpack.c.bf16 %v1360_v26, %v1360_v26 }
 0xf2d   : > { %1952 = vmatmul.mubr.msk.bf16.vlgmr.msra.gmra.mrb[40].mxu0 %vm390_vm3, %v1361_v28 }
 0xf2e   : > { %1962 = vmatpush3.bf16.xpose.msra.mxu0 %v1468_v29  ;;  %1963 = vmatprep.mubr.msk.bf16.mxu0 %vm2275_vm0, %v2274_v0 }
 0xf2f   : > { %1973 = vmatprep.subr.bf16.mxu0 %v2274_v0 }
 0xf35   : > { %1964 = vmatmul.mubr.msk.bf16.vlgmr.msra.gmra.mrb[44].mxu0 %vm343_vm2, %v1461_v30 }
 0xf36   : > { %1975 = vmatprep.mubr.msk.bf16.mxu0 %vm2275_vm0, %v2274_v0  ;;  %1974 = vmatpush3.bf16.msra.mxu0 %v1577_v50 }
0x1000   : > { %v1404_v33 = vpop.f32.mrb[40].mxu0 }
0x1001   : > { %v1410_v34 = vpack.c.bf16 %v1404_v33, %v1404_v33  ;;  %v1953_v35 = vpop.f32.mrb[41].mxu0 }
0x1002   : > { %v1407_v36 = vpop.f32.mrb[42].mxu0 }
0x1003   : > { %v1954_v37 = vpop.f32.mrb[43].mxu0  ;;  %1958 = vmatmul.mubr.msk.bf16.vlgmr.msra.gmra.mrb[40].mxu1 %vm343_vm2, %v1410_v34 }
0x1004   : > { %1969 = vmatprep.mubr.msk.bf16.mxu1 %vm2275_vm0, %v2274_v0 }
0x1008   : > { %v1504_v38 = vpop.f32.mrb[44].mxu0 }
0x1009   : > { %v1965_v39 = vpop.f32.mrb[45].mxu0  ;;  %v1510_v40 = vsel %vm390_vm3, %v1504_v38, -inf }
0x100a   : > { %1511 = vmax.xlane.f32.xlu0 %v1510_v40  ;;  %v1507_v41 = vpop.f32.mrb[46].mxu0 }
0x100b   : > { %v1966_v42 = vpop.f32.mrb[47].mxu0 }
0x1020   : > { %1522 = vrot.lane.b32.xlu0 %v2525_v9, %s2298_s8 }
0x1097   : > { %v1512_v43 = vpop.xlane.xlu0 %1511 }
0x1098   : > { %v1513_v44 = vsub.f32 %v1504_v38, %v1512_v43 }
0x109a   : > { %v1514_v45 = vmul.f32 1.442695, %v1513_v44 }
0x109b   : > { %v1523_v46 = vpop.permute.xlu0 %1522 }
0x109c   : > { %2105 = vpow2.f32 %v1514_v45  ;;  %v1528_v47 = vsel %vm408_vm4, %v1523_v46, 0 }
0x109d   : > { %1968 = vmatpush3.bf16.msra.mxu1 %v1528_v47 }
0x10a6   : > { %v2106_v48 = vpop.eup %2105 }
0x10a7   : > { %v1516_v0 = vsel %vm390_vm3, %v2106_v48, 0.0 }
0x10a8   : > { %1517 = vadd.xlane.f32.xlu1 %v1516_v0 }
0x10d6   : > { %v1453_v51 = vpop.f32.mrb[40].mxu1 }
0x10d7   : > { %v1459_v52 = vadd.f32 %v1453_v51, %v1299_v18  ;;  %v1959_v9 = vpop.f32.mrb[41].mxu1 }
0x10d8   : > { %v1456_v53 = vpop.f32.mrb[42].mxu1 }
0x10d9   : > { %v1960_v54 = vpop.f32.mrb[43].mxu1 }
0x1135   : > { %v1518_v55 = vpop.xlane.xlu1 %1517 }
0x1136   : > { %2107 = vrcp.f32 %v1518_v55 }
0x1140   : > { %v2108_v56 = vpop.eup %2107 }
0x1141   : > { %v1520_v57 = vmul.f32 %v2108_v56, %v2106_v48 }
0x1143   : > { %v1521_v58 = vpack.c.bf16 %v1520_v57, %v1520_v57 }
0x1145   : > { %1970 = vmatmul.mubr.msk.bf16.vlgmr.msra.gmra.mrb[44].mxu1 %vm390_vm3, %v1521_v58 }
0x1218   : > { %v1564_v59 = vpop.f32.mrb[44].mxu1 }
0x1219   : > { %v1570_v60 = vpack.c.bf16 %v1564_v59, %v1564_v59  ;;  %v1971_v61 = vpop.f32.mrb[45].mxu1 }
0x121a   : > { %v1567_v62 = vpop.f32.mrb[46].mxu1 }
0x121b   : > { %v1972_v63 = vpop.f32.mrb[47].mxu1  ;;  %1976 = vmatmul.mubr.msk.bf16.vlgmr.msra.gmra.mrb[48].mxu0 %vm343_vm2, %v1570_v60 }
0x12ee   : > { %v1613_v2 = vpop.f32.mrb[48].mxu0 }
0x12ef   : > { %v1619_v3 = vadd.f32 %v1613_v2, %v1459_v52  ;;  %v1977_v4 = vpop.f32.mrb[49].mxu0 }
0x12f0   : > { %v1616_v5 = vpop.f32.mrb[50].mxu0 }
0x12f1   : > { %v1626_v6 = vadd.f32 %v1771_v1, %v1619_v3  ;;  %v1978_v7 = vpop.f32.mrb[51].mxu0 }
0x12f3   : > { %1627 = vst.msk [vmem:[%s268_s23] sm:$0xff] %vm294_vm1, %v1626_v6 }
0x12f4   : > { %2208 = shalt.err (!%p2205_p2)
}
0x12f5   : > { %s2209_s14 = scalar_lea.hbm %s2692_s28, 128  ;;  %s2213_s9 = scalar_lea.hbm %s2742_s5, 256 }
0x12f6   : > { %p2210_p13 = scmp.ne.s32.totalorder %s2692_s28, %s2209_s14  ;;  %p2214_p4 = scmp.lt.u32.totalorder %s2692_s28, %s2742_s5 }
0x12f7   : > { %p2215_p7 = scmp.lt.u32.totalorder %s2213_s9, %s2209_s14  ;;  %p2217_p8 = scmp.lt.u32.totalorder %s2209_s14, %s2692_s28 }
0x12f8   : > { %p2211_p6 = pnand %p2210_p13, %p2756_p0 }
0x12f9   : > { %p2216_p11 = por %p2215_p7, %p2214_p4 }
0x12fa   : > { %p2212_p10 = pneg %p2211_p6 }
0x12fb   : > { %p2218_p1 = por %p2217_p8, %p2216_p11 }
0x12fd   : > { %p2219_p3 = pnand %p2218_p1, %p2212_p10 }
0x12ff   : > { %2222 = shalt.err (!%p2219_p3)
}
0x1300   : > { %1989 = dma.vmem_to_hbm [thread:$0]  (%p2756_p0), %s2694_s24, 128, %s2692_s28, %s1629_s22  }
0x1301 PF: > { %s1654_s17 = sand.u32 1, %s2253_s18   ;;  %p2757_p5 = scmp.ne.s32.totalorder %s2747_s25, 0 }
0x1302   : > { %p2758_p9 = scmp.ge.s32.totalorder %s2265_s21, 2  ;;  %s1655_s23 = scalar_lea.sflag [#allocation4], %s1654_s17 }
0x1304   : > { %p2003_p12 = pnand %p2758_p9, %p2757_p5 }
0x1306   : > { %2248 = dma.done.wait (!%p2003_p12), %s1655_s23, 128  }
0x1307   : > { %2250 = vsyncadd (!%p2003_p12), %s1655_s23, 4294967168  ;;  %p19_p2 = scmp.ge.s32.totalorder %s2440_s16, 4   ;;  %s2759_s18 = smov %s2257_s19 }
0x1308   : > { %s2760_s19 = smov %s2261_s20  ;;  %s2761_s20 = smov %s2449_s27 }
0x1309   : > { %s2762_s21 = smov %s2440_s16  ;;  %21 = sbr.rel (!%p19_p2) target bundleno = 6 (0x6), region = 100 }
0x1310   :  { %1660 = vsyncpa [#allocation3], 1 }
0x1311   :  { %1662 = vsyncpa [#allocation3 + $0x1], 1 }
0x1312   :  { %1663 = vsyncpa [#allocation6], 1 }
0x1313   :  { %1664 = vsyncpa [#allocation4], 1 }
0x1314   :  { %1666 = vsyncpa [#allocation4 + $0x1], 1 }

</bundles_post_ra>
